<compile_context>
chip_gen: v6e
topology: v6e:2x2x1
jax: 0.10.0
libtpu: 0.0.40
codegen_flags: <defaults>
</compile_context>

<pallas_src>
import functools

import jax
import jax.numpy as jnp
from jax import lax
from jax.experimental import pallas as pl
from jax.experimental.pallas import tpu as pltpu

# ----- hparams used for the demo (ConvolutionalModule / FullyConnectedModule defaults) -----
INPUT_CHANNELS = 1
INPUT_SIZE = 16                       # 16x16 -> 8 -> 4 -> 2 -> 1 after four stride-2 convs
CONV_FEATURE_MAPS = [32, 32, 64, 64]
KERNEL_SIZE, STRIDE, PADDING = 4, 2, 1
FC_HIDDEN_LAYERS = [256, 128, 32]

COMPUTE_DTYPE = jnp.bfloat16          # MXU-native inputs; accumulation stays f32


# =========================== Pallas kernels ===========================

def _linear_relu_kernel(x_ref, w_ref, b_ref, o_ref, *, relu):
    """One row-tile of: act(x @ W + b). W/b are VMEM-resident across the grid."""
    x = x_ref[...].astype(COMPUTE_DTYPE)
    acc = jnp.dot(x, w_ref[...], preferred_element_type=jnp.float32)
    acc = acc + b_ref[...]
    if relu:
        acc = jnp.maximum(acc, 0.0)
    o_ref[...] = acc.astype(o_ref.dtype)


def pallas_linear(x, w, b, *, relu=True, tile_m=512):
    """y = act(x @ w + b).  x:(M,K) f32, w:(K,N) bf16, b:(1,N) f32 -> (M,N) f32."""
    M, K = x.shape
    N = w.shape[1]
    tm = M if M <= tile_m else tile_m                 # full block for small M, else 8-aligned tile
    m_pad = -(-M // tm) * tm
    if m_pad != M:
        x = jnp.pad(x, ((0, m_pad - M), (0, 0)))
    out = pl.pallas_call(
        functools.partial(_linear_relu_kernel, relu=relu),
        out_shape=jax.ShapeDtypeStruct((m_pad, N), jnp.float32),
        grid=(m_pad // tm,),
        in_specs=[
            pl.BlockSpec((tm, K), lambda i: (i, 0)),   # streamed activation tile
            pl.BlockSpec((K, N), lambda i: (0, 0)),    # resident weight
            pl.BlockSpec((1, N), lambda i: (0, 0)),    # resident bias
        ],
        out_specs=pl.BlockSpec((tm, N), lambda i: (i, 0)),
        compiler_params=pltpu.CompilerParams(dimension_semantics=("parallel",)),
    )(x, w, b)
    return out if m_pad == M else out[:M]


def _mlp_kernel(x_ref, *refs, num_layers, final_relu):
    """Fused MLP on a batch tile, batch on the lane dim: h = act(W @ h + b) per layer."""
    o_ref = refs[-1]
    h = x_ref[...]
    for layer in range(num_layers):
        w = refs[2 * layer][...]            # (out_l, in_l)  bf16
        b = refs[2 * layer + 1][...]        # (out_l, 1)     f32
        h = jnp.dot(w, h.astype(COMPUTE_DTYPE), preferred_element_type=jnp.float32) + b
        if layer < num_layers - 1 or final_relu:
            h = jnp.maximum(h, 0.0)
    o_ref[...] = h.astype(o_ref.dtype)


def pallas_mlp(x, weights, biases, *, final_relu=True, tile_b=1024):
    """Fused MLP.  x:(B,F) f32, weights[l]:(out,in) bf16, biases[l]:(out,) f32 -> (B,out_last)."""
    B, F = x.shape
    num_layers = len(weights)
    out_dim = weights[-1].shape[0]
    tb = B if B <= tile_b else tile_b                 # lane tile: full B or multiple of 128
    b_pad = -(-B // tb) * tb
    xt = x.T                                          # (F, B): batch on lanes -> lane-dense stores
    if b_pad != B:
        xt = jnp.pad(xt, ((0, 0), (0, b_pad - B)))

    in_specs = [pl.BlockSpec((F, tb), lambda i: (0, i))]
    args = [xt]
    for w, b in zip(weights, biases):
        in_specs.append(pl.BlockSpec(w.shape, lambda i: (0, 0)))            # resident weight
        in_specs.append(pl.BlockSpec((w.shape[0], 1), lambda i: (0, 0)))    # resident bias
        args.append(w)
        args.append(b.reshape(-1, 1))

    out_t = pl.pallas_call(
        functools.partial(_mlp_kernel, num_layers=num_layers, final_relu=final_relu),
        out_shape=jax.ShapeDtypeStruct((out_dim, b_pad), jnp.float32),
        grid=(b_pad // tb,),
        in_specs=in_specs,
        out_specs=pl.BlockSpec((out_dim, tb), lambda i: (0, i)),
        compiler_params=pltpu.CompilerParams(dimension_semantics=("parallel",)),
    )(*args)
    if b_pad != B:
        out_t = out_t[:, :B]
    return out_t.T


# =========================== wrappers ===========================

def _im2col(x, ksize, stride, pad):
    """NHWC -> (B*OH*OW, ksize*ksize*C) patch matrix (feature order: kh, kw, cin)."""
    B, H, W, C = x.shape
    oh = (H + 2 * pad - ksize) // stride + 1
    ow = (W + 2 * pad - ksize) // stride + 1
    xp = jnp.pad(x, ((0, 0), (pad, pad), (pad, pad), (0, 0)))
    cols = []
    for i in range(ksize):
        for j in range(ksize):
            cols.append(lax.slice(
                xp,
                (0, i, j, 0),
                (B, i + stride * (oh - 1) + 1, j + stride * (ow - 1) + 1, C),
                (1, stride, stride, 1)))
    patches = jnp.stack(cols, axis=3)                 # (B, oh, ow, k*k, C)
    return patches.reshape(B * oh * ow, ksize * ksize * C), (B, oh, ow)


def encoder_forward(x_nchw, params):
    """ConvolutionalEncoder.forward: x (B, Cin, H, W) f32 -> (B, 32) f32."""
    x = jnp.transpose(x_nchw, (0, 2, 3, 1))           # NHWC for the conv pipeline
    for w_mat, b in zip(params["conv_w_mat"], params["conv_b"]):
        patches, (B, oh, ow) = _im2col(x, KERNEL_SIZE, STRIDE, PADDING)
        y = pallas_linear(patches, w_mat, b, relu=True)     # conv + bias + ReLU fused
        x = y.reshape(B, oh, ow, w_mat.shape[1])
    # torch.flatten(x, start_dim=1) on the NCHW tensor:
    x = jnp.transpose(x, (0, 3, 1, 2)).reshape(x.shape[0], -1)
    return pallas_mlp(x, params["fc_w"], params["fc_b"], final_relu=True)


def conv_output_hw(size):
    for _ in CONV_FEATURE_MAPS:
        size = (size - KERNEL_SIZE + 2 * PADDING) // STRIDE + 1
    return size


def init_params(key):
    """Deterministic PyTorch-style init: U(-1/sqrt(fan_in), 1/sqrt(fan_in))."""
    params = {"conv_w_hwio": [], "conv_w_mat": [], "conv_b": [],
              "fc_w_f32": [], "fc_w": [], "fc_b": []}
    cins = [INPUT_CHANNELS] + CONV_FEATURE_MAPS[:-1]
    for cin, cout in zip(cins, CONV_FEATURE_MAPS):
        key, kw, kb = jax.random.split(key, 3)
        fan_in = cin * KERNEL_SIZE * KERNEL_SIZE
        bound = 1.0 / (fan_in ** 0.5)
        w = jax.random.uniform(kw, (KERNEL_SIZE, KERNEL_SIZE, cin, cout),
                               jnp.float32, -bound, bound)
        b = jax.random.uniform(kb, (cout,), jnp.float32, -bound, bound)
        params["conv_w_hwio"].append(w)
        params["conv_w_mat"].append(w.reshape(-1, cout).astype(COMPUTE_DTYPE))
        params["conv_b"].append(b.reshape(1, cout))

    hw = conv_output_hw(INPUT_SIZE)
    dims = [CONV_FEATURE_MAPS[-1] * hw * hw] + FC_HIDDEN_LAYERS
    for din, dout in zip(dims[:-1], dims[1:]):
        key, kw, kb = jax.random.split(key, 3)
        bound = 1.0 / (din ** 0.5)
        w = jax.random.uniform(kw, (dout, din), jnp.float32, -bound, bound)   # PyTorch (out,in)
        b = jax.random.uniform(kb, (dout,), jnp.float32, -bound, bound)
        params["fc_w_f32"].append(w)
        params["fc_w"].append(w.astype(COMPUTE_DTYPE))
        params["fc_b"].append(b)
    return params


def reference_forward(x_nchw, params):
    """Pure-JAX f32 reference of ConvolutionalEncoder.forward."""
    x = jnp.transpose(x_nchw, (0, 2, 3, 1))
    for w, b in zip(params["conv_w_hwio"], params["conv_b"]):
        x = lax.conv_general_dilated(
            x, w, window_strides=(STRIDE, STRIDE),
            padding=[(PADDING, PADDING), (PADDING, PADDING)],
            dimension_numbers=("NHWC", "HWIO", "NHWC"))
        x = jnp.maximum(x + b.reshape(1, 1, 1, -1), 0.0)
    x = jnp.transpose(x, (0, 3, 1, 2)).reshape(x.shape[0], -1)
    for w, b in zip(params["fc_w_f32"], params["fc_b"]):
        x = jnp.maximum(x @ w.T + b, 0.0)             # final_activation=True
    return x


if __name__ == "__main__":
    key = jax.random.PRNGKey(0)
    pkey, xkey = jax.random.split(key)
    params = init_params(pkey)

    B = 2
    x = jax.random.normal(xkey, (B, INPUT_CHANNELS, INPUT_SIZE, INPUT_SIZE), jnp.float32)

    fwd = jax.jit(encoder_forward)
    out = jax.block_until_ready(fwd(x, params))
    ref = reference_forward(x, params)

    assert out.shape == (B, FC_HIDDEN_LAYERS[-1]), out.shape
    # bf16 matmul inputs with f32 accumulation -> compare with scale-relative tolerance
    err = float(jnp.max(jnp.abs(out - ref)))
    scale = float(jnp.max(jnp.abs(ref))) + 1e-6
    assert err / scale < 3e-2, (err, scale)

    print("KERNEL_OK")
</pallas_src>

<mosaic_0001>
module attributes {stable_mosaic.version = 11 : i64} {
  func.func @_linear_relu_kernel(%arg0: i32, %arg1: memref<128x16xf32, #tpu.memory_space<vmem>>, %arg2: memref<16x32xbf16, #tpu.memory_space<vmem>>, %arg3: memref<1x32xf32, #tpu.memory_space<vmem>>, %arg4: memref<128x32xf32, #tpu.memory_space<vmem>>) attributes {dimension_semantics = [#tpu.dimension_semantics<parallel>], iteration_bounds = array<i64: 1>, scalar_prefetch = 0 : i64, scratch_operands = 0 : i64, tpu.core_type = #tpu.core_type<tc>, window_params = [{transform_indices = @transform_0, window_bounds = array<i64: 128, 16>}, {pipeline_mode = #tpu.pipeline_mode<synchronous>, transform_indices = @transform_1, window_bounds = array<i64: 16, 32>}, {pipeline_mode = #tpu.pipeline_mode<synchronous>, transform_indices = @transform_2, window_bounds = array<i64: 1, 32>}, {transform_indices = @transform_3, window_bounds = array<i64: 128, 32>}]} {
    %c0 = arith.constant 0 : index
    %c0_0 = arith.constant 0 : index
    %0 = vector.load %arg1[%c0, %c0_0] : memref<128x16xf32, #tpu.memory_space<vmem>>, vector<128x16xf32>
    %1 = arith.truncf %0 : vector<128x16xf32> to vector<128x16xbf16>
    %c0_1 = arith.constant 0 : index
    %c0_2 = arith.constant 0 : index
    %2 = vector.load %arg2[%c0_1, %c0_2] : memref<16x32xbf16, #tpu.memory_space<vmem>>, vector<16x32xbf16>
    %cst = arith.constant dense<0.000000e+00> : vector<128x32xf32>
    %3 = tpu.matmul %1, %2, %cst {dimension_numbers = #tpu.dot_dimension_numbers<[1], [0], [0], [1], [0, 0, 1, 1], [], []>} : vector<128x16xbf16>, vector<16x32xbf16>, vector<128x32xf32> -> vector<128x32xf32>
    %c0_3 = arith.constant 0 : index
    %c0_4 = arith.constant 0 : index
    %4 = vector.load %arg3[%c0_3, %c0_4] : memref<1x32xf32, #tpu.memory_space<vmem>>, vector<1x32xf32>
    %5 = vector.broadcast %4 : vector<1x32xf32> to vector<128x32xf32>
    %6 = arith.addf %3, %5 : vector<128x32xf32>
    %cst_5 = arith.constant 0.000000e+00 : f32
    %7 = vector.broadcast %cst_5 : f32 to vector<128x32xf32>
    %8 = arith.maximumf %6, %7 : vector<128x32xf32>
    %c0_6 = arith.constant 0 : index
    %c0_7 = arith.constant 0 : index
    %9 = vector.load %arg4[%c0_6, %c0_7] : memref<128x32xf32, #tpu.memory_space<vmem>>, vector<128x32xf32>
    tpu.vector_store %arg4[%c0_6, %c0_7], %8 {strides = array<i32>} : memref<128x32xf32, #tpu.memory_space<vmem>>, vector<128x32xf32>,
    return
  }
  func.func @transform_0(%arg0: i32) -> (i32, i32) {
    %c0_i32 = arith.constant 0 : i32
    %c0_i32_0 = arith.constant 0 : i32
    return %arg0, %c0_i32 : i32, i32
  }
  func.func @transform_1(%arg0: i32) -> (i32, i32) {
    %c0_i32 = arith.constant 0 : i32
    %c0_i32_0 = arith.constant 0 : i32
    %c0_i32_1 = arith.constant 0 : i32
    return %c0_i32, %c0_i32_0 : i32, i32
  }
  func.func @transform_2(%arg0: i32) -> (i32, i32) {
    %c0_i32 = arith.constant 0 : i32
    %c0_i32_0 = arith.constant 0 : i32
    %c0_i32_1 = arith.constant 0 : i32
    return %c0_i32, %c0_i32_0 : i32, i32
  }
  func.func @transform_3(%arg0: i32) -> (i32, i32) {
    %c0_i32 = arith.constant 0 : i32
    %c0_i32_0 = arith.constant 0 : i32
    return %arg0, %c0_i32 : i32, i32
  }
}

module attributes {stable_mosaic.version = 11 : i64} {
  func.func @_linear_relu_kernel(%arg0: i32, %arg1: memref<32x512xf32, #tpu.memory_space<vmem>>, %arg2: memref<512x32xbf16, #tpu.memory_space<vmem>>, %arg3: memref<1x32xf32, #tpu.memory_space<vmem>>, %arg4: memref<32x32xf32, #tpu.memory_space<vmem>>) attributes {dimension_semantics = [#tpu.dimension_semantics<parallel>], iteration_bounds = array<i64: 1>, scalar_prefetch = 0 : i64, scratch_operands = 0 : i64, tpu.core_type = #tpu.core_type<tc>, window_params = [{transform_indices = @transform_0, window_bounds = array<i64: 32, 512>}, {pipeline_mode = #tpu.pipeline_mode<synchronous>, transform_indices = @transform_1, window_bounds = array<i64: 512, 32>}, {pipeline_mode = #tpu.pipeline_mode<synchronous>, transform_indices = @transform_2, window_bounds = array<i64: 1, 32>}, {transform_indices = @transform_3, window_bounds = array<i64: 32, 32>}]} {
    %c0 = arith.constant 0 : index
    %c0_0 = arith.constant 0 : index
    %0 = vector.load %arg1[%c0, %c0_0] : memref<32x512xf32, #tpu.memory_space<vmem>>, vector<32x512xf32>
    %1 = arith.truncf %0 : vector<32x512xf32> to vector<32x512xbf16>
    %c0_1 = arith.constant 0 : index
    %c0_2 = arith.constant 0 : index
    %2 = vector.load %arg2[%c0_1, %c0_2] : memref<512x32xbf16, #tpu.memory_space<vmem>>, vector<512x32xbf16>
    %cst = arith.constant dense<0.000000e+00> : vector<32x32xf32>
    %3 = tpu.matmul %1, %2, %cst {dimension_numbers = #tpu.dot_dimension_numbers<[1], [0], [0], [1], [0, 0, 1, 1], [], []>} : vector<32x512xbf16>, vector<512x32xbf16>, vector<32x32xf32> -> vector<32x32xf32>
    %c0_3 = arith.constant 0 : index
    %c0_4 = arith.constant 0 : index
    %4 = vector.load %arg3[%c0_3, %c0_4] : memref<1x32xf32, #tpu.memory_space<vmem>>, vector<1x32xf32>
    %5 = vector.broadcast %4 : vector<1x32xf32> to vector<32x32xf32>
    %6 = arith.addf %3, %5 : vector<32x32xf32>
    %cst_5 = arith.constant 0.000000e+00 : f32
    %7 = vector.broadcast %cst_5 : f32 to vector<32x32xf32>
    %8 = arith.maximumf %6, %7 : vector<32x32xf32>
    %c0_6 = arith.constant 0 : index
    %c0_7 = arith.constant 0 : index
    %9 = vector.load %arg4[%c0_6, %c0_7] : memref<32x32xf32, #tpu.memory_space<vmem>>, vector<32x32xf32>
    tpu.vector_store %arg4[%c0_6, %c0_7], %8 {strides = array<i32>} : memref<32x32xf32, #tpu.memory_space<vmem>>, vector<32x32xf32>,
    return
  }
  func.func @transform_0(%arg0: i32) -> (i32, i32) {
    %c0_i32 = arith.constant 0 : i32
    %c0_i32_0 = arith.constant 0 : i32
    return %arg0, %c0_i32 : i32, i32
  }
  func.func @transform_1(%arg0: i32) -> (i32, i32) {
    %c0_i32 = arith.constant 0 : i32
    %c0_i32_0 = arith.constant 0 : i32
    %c0_i32_1 = arith.constant 0 : i32
    return %c0_i32, %c0_i32_0 : i32, i32
  }
  func.func @transform_2(%arg0: i32) -> (i32, i32) {
    %c0_i32 = arith.constant 0 : i32
    %c0_i32_0 = arith.constant 0 : i32
    %c0_i32_1 = arith.constant 0 : i32
    return %c0_i32, %c0_i32_0 : i32, i32
  }
  func.func @transform_3(%arg0: i32) -> (i32, i32) {
    %c0_i32 = arith.constant 0 : i32
    %c0_i32_0 = arith.constant 0 : i32
    return %arg0, %c0_i32 : i32, i32
  }
}

module attributes {stable_mosaic.version = 11 : i64} {
  func.func @_linear_relu_kernel(%arg0: i32, %arg1: memref<8x512xf32, #tpu.memory_space<vmem>>, %arg2: memref<512x64xbf16, #tpu.memory_space<vmem>>, %arg3: memref<1x64xf32, #tpu.memory_space<vmem>>, %arg4: memref<8x64xf32, #tpu.memory_space<vmem>>) attributes {dimension_semantics = [#tpu.dimension_semantics<parallel>], iteration_bounds = array<i64: 1>, scalar_prefetch = 0 : i64, scratch_operands = 0 : i64, tpu.core_type = #tpu.core_type<tc>, window_params = [{transform_indices = @transform_0, window_bounds = array<i64: 8, 512>}, {pipeline_mode = #tpu.pipeline_mode<synchronous>, transform_indices = @transform_1, window_bounds = array<i64: 512, 64>}, {pipeline_mode = #tpu.pipeline_mode<synchronous>, transform_indices = @transform_2, window_bounds = array<i64: 1, 64>}, {transform_indices = @transform_3, window_bounds = array<i64: 8, 64>}]} {
    %c0 = arith.constant 0 : index
    %c0_0 = arith.constant 0 : index
    %0 = vector.load %arg1[%c0, %c0_0] : memref<8x512xf32, #tpu.memory_space<vmem>>, vector<8x512xf32>
    %1 = arith.truncf %0 : vector<8x512xf32> to vector<8x512xbf16>
    %c0_1 = arith.constant 0 : index
    %c0_2 = arith.constant 0 : index
    %2 = vector.load %arg2[%c0_1, %c0_2] : memref<512x64xbf16, #tpu.memory_space<vmem>>, vector<512x64xbf16>
    %cst = arith.constant dense<0.000000e+00> : vector<8x64xf32>
    %3 = tpu.matmul %1, %2, %cst {dimension_numbers = #tpu.dot_dimension_numbers<[1], [0], [0], [1], [0, 0, 1, 1], [], []>} : vector<8x512xbf16>, vector<512x64xbf16>, vector<8x64xf32> -> vector<8x64xf32>
    %c0_3 = arith.constant 0 : index
    %c0_4 = arith.constant 0 : index
    %4 = vector.load %arg3[%c0_3, %c0_4] : memref<1x64xf32, #tpu.memory_space<vmem>>, vector<1x64xf32>
    %5 = vector.broadcast %4 : vector<1x64xf32> to vector<8x64xf32>
    %6 = arith.addf %3, %5 : vector<8x64xf32>
    %cst_5 = arith.constant 0.000000e+00 : f32
    %7 = vector.broadcast %cst_5 : f32 to vector<8x64xf32>
    %8 = arith.maximumf %6, %7 : vector<8x64xf32>
    %c0_6 = arith.constant 0 : index
    %c0_7 = arith.constant 0 : index
    %9 = vector.load %arg4[%c0_6, %c0_7] : memref<8x64xf32, #tpu.memory_space<vmem>>, vector<8x64xf32>
    tpu.vector_store %arg4[%c0_6, %c0_7], %8 {strides = array<i32>} : memref<8x64xf32, #tpu.memory_space<vmem>>, vector<8x64xf32>,
    return
  }
  func.func @transform_0(%arg0: i32) -> (i32, i32) {
    %c0_i32 = arith.constant 0 : i32
    %c0_i32_0 = arith.constant 0 : i32
    return %arg0, %c0_i32 : i32, i32
  }
  func.func @transform_1(%arg0: i32) -> (i32, i32) {
    %c0_i32 = arith.constant 0 : i32
    %c0_i32_0 = arith.constant 0 : i32
    %c0_i32_1 = arith.constant 0 : i32
    return %c0_i32, %c0_i32_0 : i32, i32
  }
  func.func @transform_2(%arg0: i32) -> (i32, i32) {
    %c0_i32 = arith.constant 0 : i32
    %c0_i32_0 = arith.constant 0 : i32
    %c0_i32_1 = arith.constant 0 : i32
    return %c0_i32, %c0_i32_0 : i32, i32
  }
  func.func @transform_3(%arg0: i32) -> (i32, i32) {
    %c0_i32 = arith.constant 0 : i32
    %c0_i32_0 = arith.constant 0 : i32
    return %arg0, %c0_i32 : i32, i32
  }
}

module attributes {stable_mosaic.version = 11 : i64} {
  func.func @_linear_relu_kernel(%arg0: i32, %arg1: memref<2x1024xf32, #tpu.memory_space<vmem>>, %arg2: memref<1024x64xbf16, #tpu.memory_space<vmem>>, %arg3: memref<1x64xf32, #tpu.memory_space<vmem>>, %arg4: memref<2x64xf32, #tpu.memory_space<vmem>>) attributes {dimension_semantics = [#tpu.dimension_semantics<parallel>], iteration_bounds = array<i64: 1>, scalar_prefetch = 0 : i64, scratch_operands = 0 : i64, tpu.core_type = #tpu.core_type<tc>, window_params = [{transform_indices = @transform_0, window_bounds = array<i64: 2, 1024>}, {pipeline_mode = #tpu.pipeline_mode<synchronous>, transform_indices = @transform_1, window_bounds = array<i64: 1024, 64>}, {pipeline_mode = #tpu.pipeline_mode<synchronous>, transform_indices = @transform_2, window_bounds = array<i64: 1, 64>}, {transform_indices = @transform_3, window_bounds = array<i64: 2, 64>}]} {
    %c0 = arith.constant 0 : index
    %c0_0 = arith.constant 0 : index
    %0 = vector.load %arg1[%c0, %c0_0] : memref<2x1024xf32, #tpu.memory_space<vmem>>, vector<2x1024xf32>
    %1 = arith.truncf %0 : vector<2x1024xf32> to vector<2x1024xbf16>
    %c0_1 = arith.constant 0 : index
    %c0_2 = arith.constant 0 : index
    %2 = vector.load %arg2[%c0_1, %c0_2] : memref<1024x64xbf16, #tpu.memory_space<vmem>>, vector<1024x64xbf16>
    %cst = arith.constant dense<0.000000e+00> : vector<2x64xf32>
    %3 = tpu.matmul %1, %2, %cst {dimension_numbers = #tpu.dot_dimension_numbers<[1], [0], [0], [1], [0, 0, 1, 1], [], []>} : vector<2x1024xbf16>, vector<1024x64xbf16>, vector<2x64xf32> -> vector<2x64xf32>
    %c0_3 = arith.constant 0 : index
    %c0_4 = arith.constant 0 : index
    %4 = vector.load %arg3[%c0_3, %c0_4] : memref<1x64xf32, #tpu.memory_space<vmem>>, vector<1x64xf32>
    %5 = vector.broadcast %4 : vector<1x64xf32> to vector<2x64xf32>
    %6 = arith.addf %3, %5 : vector<2x64xf32>
    %cst_5 = arith.constant 0.000000e+00 : f32
    %7 = vector.broadcast %cst_5 : f32 to vector<2x64xf32>
    %8 = arith.maximumf %6, %7 : vector<2x64xf32>
    %c0_6 = arith.constant 0 : index
    %c0_7 = arith.constant 0 : index
    %9 = vector.load %arg4[%c0_6, %c0_7] : memref<2x64xf32, #tpu.memory_space<vmem>>, vector<2x64xf32>
    tpu.vector_store %arg4[%c0_6, %c0_7], %8 {strides = array<i32>} : memref<2x64xf32, #tpu.memory_space<vmem>>, vector<2x64xf32>,
    return
  }
  func.func @transform_0(%arg0: i32) -> (i32, i32) {
    %c0_i32 = arith.constant 0 : i32
    %c0_i32_0 = arith.constant 0 : i32
    return %arg0, %c0_i32 : i32, i32
  }
  func.func @transform_1(%arg0: i32) -> (i32, i32) {
    %c0_i32 = arith.constant 0 : i32
    %c0_i32_0 = arith.constant 0 : i32
    %c0_i32_1 = arith.constant 0 : i32
    return %c0_i32, %c0_i32_0 : i32, i32
  }
  func.func @transform_2(%arg0: i32) -> (i32, i32) {
    %c0_i32 = arith.constant 0 : i32
    %c0_i32_0 = arith.constant 0 : i32
    %c0_i32_1 = arith.constant 0 : i32
    return %c0_i32, %c0_i32_0 : i32, i32
  }
  func.func @transform_3(%arg0: i32) -> (i32, i32) {
    %c0_i32 = arith.constant 0 : i32
    %c0_i32_0 = arith.constant 0 : i32
    return %arg0, %c0_i32 : i32, i32
  }
}

module attributes {stable_mosaic.version = 11 : i64} {
  func.func @_mlp_kernel(%arg0: i32, %arg1: memref<64x2xf32, #tpu.memory_space<vmem>>, %arg2: memref<256x64xbf16, #tpu.memory_space<vmem>>, %arg3: memref<256x1xf32, #tpu.memory_space<vmem>>, %arg4: memref<128x256xbf16, #tpu.memory_space<vmem>>, %arg5: memref<128x1xf32, #tpu.memory_space<vmem>>, %arg6: memref<32x128xbf16, #tpu.memory_space<vmem>>, %arg7: memref<32x1xf32, #tpu.memory_space<vmem>>, %arg8: memref<32x2xf32, #tpu.memory_space<vmem>>) attributes {dimension_semantics = [#tpu.dimension_semantics<parallel>], iteration_bounds = array<i64: 1>, scalar_prefetch = 0 : i64, scratch_operands = 0 : i64, tpu.core_type = #tpu.core_type<tc>, window_params = [{transform_indices = @transform_0, window_bounds = array<i64: 64, 2>}, {pipeline_mode = #tpu.pipeline_mode<synchronous>, transform_indices = @transform_1, window_bounds = array<i64: 256, 64>}, {pipeline_mode = #tpu.pipeline_mode<synchronous>, transform_indices = @transform_2, window_bounds = array<i64: 256, 1>}, {pipeline_mode = #tpu.pipeline_mode<synchronous>, transform_indices = @transform_3, window_bounds = array<i64: 128, 256>}, {pipeline_mode = #tpu.pipeline_mode<synchronous>, transform_indices = @transform_4, window_bounds = array<i64: 128, 1>}, {pipeline_mode = #tpu.pipeline_mode<synchronous>, transform_indices = @transform_5, window_bounds = array<i64: 32, 128>}, {pipeline_mode = #tpu.pipeline_mode<synchronous>, transform_indices = @transform_6, window_bounds = array<i64: 32, 1>}, {transform_indices = @transform_7, window_bounds = array<i64: 32, 2>}]} {
    %c0 = arith.constant 0 : index
    %c0_0 = arith.constant 0 : index
    %0 = vector.load %arg1[%c0, %c0_0] : memref<64x2xf32, #tpu.memory_space<vmem>>, vector<64x2xf32>
    %c0_1 = arith.constant 0 : index
    %c0_2 = arith.constant 0 : index
    %1 = vector.load %arg2[%c0_1, %c0_2] : memref<256x64xbf16, #tpu.memory_space<vmem>>, vector<256x64xbf16>
    %c0_3 = arith.constant 0 : index
    %c0_4 = arith.constant 0 : index
    %2 = vector.load %arg3[%c0_3, %c0_4] : memref<256x1xf32, #tpu.memory_space<vmem>>, vector<256x1xf32>
    %3 = arith.truncf %0 : vector<64x2xf32> to vector<64x2xbf16>
    %cst = arith.constant dense<0.000000e+00> : vector<256x2xf32>
    %4 = tpu.matmul %1, %3, %cst {dimension_numbers = #tpu.dot_dimension_numbers<[1], [0], [0], [1], [0, 0, 1, 1], [], []>} : vector<256x64xbf16>, vector<64x2xbf16>, vector<256x2xf32> -> vector<256x2xf32>
    %5 = vector.broadcast %2 : vector<256x1xf32> to vector<256x2xf32>
    %6 = arith.addf %4, %5 : vector<256x2xf32>
    %cst_5 = arith.constant 0.000000e+00 : f32
    %7 = vector.broadcast %cst_5 : f32 to vector<256x2xf32>
    %8 = arith.maximumf %6, %7 : vector<256x2xf32>
    %c0_6 = arith.constant 0 : index
    %c0_7 = arith.constant 0 : index
    %9 = vector.load %arg4[%c0_6, %c0_7] : memref<128x256xbf16, #tpu.memory_space<vmem>>, vector<128x256xbf16>
    %c0_8 = arith.constant 0 : index
    %c0_9 = arith.constant 0 : index
    %10 = vector.load %arg5[%c0_8, %c0_9] : memref<128x1xf32, #tpu.memory_space<vmem>>, vector<128x1xf32>
    %11 = arith.truncf %8 : vector<256x2xf32> to vector<256x2xbf16>
    %cst_10 = arith.constant dense<0.000000e+00> : vector<128x2xf32>
    %12 = tpu.matmul %9, %11, %cst_10 {dimension_numbers = #tpu.dot_dimension_numbers<[1], [0], [0], [1], [0, 0, 1, 1], [], []>} : vector<128x256xbf16>, vector<256x2xbf16>, vector<128x2xf32> -> vector<128x2xf32>
    %13 = vector.broadcast %10 : vector<128x1xf32> to vector<128x2xf32>
    %14 = arith.addf %12, %13 : vector<128x2xf32>
    %cst_11 = arith.constant 0.000000e+00 : f32
    %15 = vector.broadcast %cst_11 : f32 to vector<128x2xf32>
    %16 = arith.maximumf %14, %15 : vector<128x2xf32>
    %c0_12 = arith.constant 0 : index
    %c0_13 = arith.constant 0 : index
    %17 = vector.load %arg6[%c0_12, %c0_13] : memref<32x128xbf16, #tpu.memory_space<vmem>>, vector<32x128xbf16>
    %c0_14 = arith.constant 0 : index
    %c0_15 = arith.constant 0 : index
    %18 = vector.load %arg7[%c0_14, %c0_15] : memref<32x1xf32, #tpu.memory_space<vmem>>, vector<32x1xf32>
    %19 = arith.truncf %16 : vector<128x2xf32> to vector<128x2xbf16>
    %cst_16 = arith.constant dense<0.000000e+00> : vector<32x2xf32>
    %20 = tpu.matmul %17, %19, %cst_16 {dimension_numbers = #tpu.dot_dimension_numbers<[1], [0], [0], [1], [0, 0, 1, 1], [], []>} : vector<32x128xbf16>, vector<128x2xbf16>, vector<32x2xf32> -> vector<32x2xf32>
    %21 = vector.broadcast %18 : vector<32x1xf32> to vector<32x2xf32>
    %22 = arith.addf %20, %21 : vector<32x2xf32>
    %cst_17 = arith.constant 0.000000e+00 : f32
    %23 = vector.broadcast %cst_17 : f32 to vector<32x2xf32>
    %24 = arith.maximumf %22, %23 : vector<32x2xf32>
    %c0_18 = arith.constant 0 : index
    %c0_19 = arith.constant 0 : index
    %25 = vector.load %arg8[%c0_18, %c0_19] : memref<32x2xf32, #tpu.memory_space<vmem>>, vector<32x2xf32>
    tpu.vector_store %arg8[%c0_18, %c0_19], %24 {strides = array<i32>} : memref<32x2xf32, #tpu.memory_space<vmem>>, vector<32x2xf32>,
    return
  }
  func.func @transform_0(%arg0: i32) -> (i32, i32) {
    %c0_i32 = arith.constant 0 : i32
    %c0_i32_0 = arith.constant 0 : i32
    return %c0_i32, %arg0 : i32, i32
  }
  func.func @transform_1(%arg0: i32) -> (i32, i32) {
    %c0_i32 = arith.constant 0 : i32
    %c0_i32_0 = arith.constant 0 : i32
    %c0_i32_1 = arith.constant 0 : i32
    return %c0_i32, %c0_i32_0 : i32, i32
  }
  func.func @transform_2(%arg0: i32) -> (i32, i32) {
    %c0_i32 = arith.constant 0 : i32
    %c0_i32_0 = arith.constant 0 : i32
    %c0_i32_1 = arith.constant 0 : i32
    return %c0_i32, %c0_i32_0 : i32, i32
  }
  func.func @transform_3(%arg0: i32) -> (i32, i32) {
    %c0_i32 = arith.constant 0 : i32
    %c0_i32_0 = arith.constant 0 : i32
    %c0_i32_1 = arith.constant 0 : i32
    return %c0_i32, %c0_i32_0 : i32, i32
  }
  func.func @transform_4(%arg0: i32) -> (i32, i32) {
    %c0_i32 = arith.constant 0 : i32
    %c0_i32_0 = arith.constant 0 : i32
    %c0_i32_1 = arith.constant 0 : i32
    return %c0_i32, %c0_i32_0 : i32, i32
  }
  func.func @transform_5(%arg0: i32) -> (i32, i32) {
    %c0_i32 = arith.constant 0 : i32
    %c0_i32_0 = arith.constant 0 : i32
    %c0_i32_1 = arith.constant 0 : i32
    return %c0_i32, %c0_i32_0 : i32, i32
  }
  func.func @transform_6(%arg0: i32) -> (i32, i32) {
    %c0_i32 = arith.constant 0 : i32
    %c0_i32_0 = arith.constant 0 : i32
    %c0_i32_1 = arith.constant 0 : i32
    return %c0_i32, %c0_i32_0 : i32, i32
  }
  func.func @transform_7(%arg0: i32) -> (i32, i32) {
    %c0_i32 = arith.constant 0 : i32
    %c0_i32_0 = arith.constant 0 : i32
    return %c0_i32, %arg0 : i32, i32
  }
}

</mosaic_0001>

<bundles_post_ra>
// kernel: encoder_forward.5
= control target key start
LH: loop header
LB: loop body
LE: loop exit
PB: predicated region body
PF: predicated region fallthrough
CT: control target
= control target key end

     0   :  { %vm54_vm0 = vcmask 130048   ;;  %vm192_vm1 = vcmask 261120   ;;  %s399_s1 = inlined_call_operand.vmem [shape: bf16[16,32], index: 1, kind: input, shape index: {}]   ;;  %s400_s0 = inlined_call_operand.vmem [shape: f32[128,16], index: 0, kind: input, shape index: {}]   ;;  %s401_s2 = inlined_call_operand.vmem [shape: f32[1,32], index: 2, kind: input, shape index: {}]   ;;  %s402_s3 = inlined_call_operand.vmem [shape: f32[128,32], index: 3, kind: output, shape index: {}]  }
   0x1   :  { %v252_v0 = vld [vmem:[%s399_s1] sm:$0xff]   ;;  %v16_v2 = vld [vmem:[%s400_s0 + $0x8] sm:$0xff]  ;;  %v17_v6 = vld [vmem:[%s400_s0 + $0x10] sm:$0xff] }
   0x2   :  { %v15_v1 = vld [vmem:[%s400_s0] sm:$0xff]  ;;  %232 = vmatprep.subr.bf16.mxu0 %v252_v0  ;;  %250 = vmatprep.subr.bf16.mxu1 %v252_v0  ;;  %v24_v5 = vld [vmem:[%s400_s0 + $0x48] sm:$0xff]  ;;  %v18_v7 = vld [vmem:[%s400_s0 + $0x18] sm:$0xff] }
   0x3   :  { %v23_v3 = vld [vmem:[%s400_s0 + $0x40] sm:$0xff]  ;;  %v31_v4 = vpack.c.bf16 %v16_v2, %v15_v1  ;;  %233 = vmatpush3.bf16.msra.mxu0 %v252_v0  ;;  %251 = vmatpush3.bf16.msra.mxu1 %v252_v0  ;;  %v32_v9 = vpack.c.bf16 %v18_v7, %v17_v6  ;;  %v25_v10 = vld [vmem:[%s400_s0 + $0x50] sm:$0xff]  ;;  %v26_v11 = vld [vmem:[%s400_s0 + $0x58] sm:$0xff] }
   0x4   :  { %v35_v8 = vpack.c.bf16 %v24_v5, %v23_v3  ;;  %v19_v12 = vld [vmem:[%s400_s0 + $0x20] sm:$0xff]  ;;  %v36_v13 = vpack.c.bf16 %v26_v11, %v25_v10  ;;  %v20_v14 = vld [vmem:[%s400_s0 + $0x28] sm:$0xff]  ;;  %v21_v19 = vld [vmem:[%s400_s0 + $0x30] sm:$0xff] }
   0x5   :  { %234 = vmatprep.mubr.msk.bf16.mxu0 %vm54_vm0, %v31_v4  ;;  %v27_v15 = vld [vmem:[%s400_s0 + $0x60] sm:$0xff]  ;;  %v28_v16 = vld [vmem:[%s400_s0 + $0x68] sm:$0xff]  ;;  %v33_v17 = vpack.c.bf16 %v20_v14, %v19_v12  ;;  %v22_v20 = vld [vmem:[%s400_s0 + $0x38] sm:$0xff] }
   0x6   :  { %242 = vmatprep.mubr.msk.bf16.mxu1 %vm54_vm0, %v35_v8  ;;  %v37_v18 = vpack.c.bf16 %v28_v16, %v27_v15  ;;  %235 = vmatmul.mubr.msk.bf16.vlgmr.msra.gmra.mxu0 %vm54_vm0, %v32_v9  ;;  %v29_v21 = vld [vmem:[%s400_s0 + $0x70] sm:$0xff]  ;;  %v30_v22 = vld [vmem:[%s400_s0 + $0x78] sm:$0xff]  ;;  %v34_v23 = vpack.c.bf16 %v22_v20, %v21_v19  ;;  %v213_v25 = vld [vmem:[%s401_s2] ss:$0 sm:$0xff] }
   0x7   :  { %243 = vmatmul.mubr.msk.bf16.vlgmr.msra.gmra.mxu1 %vm54_vm0, %v36_v13  ;;  %238 = vmatprep.mubr.msk.bf16.mxu0 %vm54_vm0, %v33_v17  ;;  %v38_v24 = vpack.c.bf16 %v30_v22, %v29_v21 }
   0x8   :  { %246 = vmatprep.mubr.msk.bf16.mxu1 %vm54_vm0, %v37_v18 }
   0xe   :  { %239 = vmatmul.mubr.msk.bf16.gmra.mxu0 %vm54_vm0, %v34_v23 }
   0xf   :  { %247 = vmatmul.mubr.msk.bf16.gmra.mxu1 %vm54_vm0, %v38_v24 }
  0xc6   :  { %v236_v26 = vpop.f32.mrf.mxu0 }
  0xc7   :  { %v244_v27 = vpop.f32.mrf.mxu1  ;;  %v122_v28 = vadd.f32 %v236_v26, %v213_v25 }
  0xc8   :  { %v154_v29 = vadd.f32 %v244_v27, %v213_v25  ;;  %v113_v30 = vpop.f32.mrf.mxu0 }
  0xc9   :  { %v145_v31 = vpop.f32.mrf.mxu1  ;;  %v178_v32 = vmax.f32 %v122_v28, 0.0  ;;  %v114_v34 = vadd.f32 %v213_v25, %v113_v30 }
  0xca   :  { %v186_v33 = vmax.f32 %v154_v29, 0.0  ;;  %v146_v35 = vadd.f32 %v213_v25, %v145_v31  ;;  %v237_v36 = vpop.f32.mrf.mxu0 }
  0xcb   :  { %v245_v37 = vpop.f32.mrf.mxu1  ;;  %195 = vst.msk [vmem:[%s402_s3 + $0x10] sm:$0xff] %vm192_vm1, %v178_v32  ;;  %v176_v38 = vmax.f32 %v114_v34, 0.0  ;;  %v125_v40 = vadd.f32 %v237_v36, %v213_v25 }
  0xcc   :  { %203 = vst.msk [vmem:[%s402_s3 + $0x50] sm:$0xff] %vm192_vm1, %v186_v33  ;;  %v184_v39 = vmax.f32 %v146_v35, 0.0  ;;  %v157_v41 = vadd.f32 %v245_v37, %v213_v25  ;;  %v116_v42 = vpop.f32.mrf.mxu0 }
  0xcd   :  { %v148_v43 = vpop.f32.mrf.mxu1  ;;  %193 = vst.msk [vmem:[%s402_s3] sm:$0xff] %vm192_vm1, %v176_v38  ;;  %v179_v44 = vmax.f32 %v125_v40, 0.0  ;;  %v117_v46 = vadd.f32 %v213_v25, %v116_v42 }
  0xce   :  { %201 = vst.msk [vmem:[%s402_s3 + $0x40] sm:$0xff] %vm192_vm1, %v184_v39  ;;  %v187_v45 = vmax.f32 %v157_v41, 0.0  ;;  %v149_v47 = vadd.f32 %v213_v25, %v148_v43  ;;  %v240_v48 = vpop.f32.mrf.mxu0 }
  0xcf   :  { %v248_v49 = vpop.f32.mrf.mxu1  ;;  %196 = vst.msk [vmem:[%s402_s3 + $0x18] sm:$0xff] %vm192_vm1, %v179_v44  ;;  %v177_v50 = vmax.f32 %v117_v46, 0.0  ;;  %v138_v52 = vadd.f32 %v240_v48, %v213_v25 }
  0xd0   :  { %204 = vst.msk [vmem:[%s402_s3 + $0x58] sm:$0xff] %vm192_vm1, %v187_v45  ;;  %v185_v51 = vmax.f32 %v149_v47, 0.0  ;;  %v170_v53 = vadd.f32 %v248_v49, %v213_v25  ;;  %v129_v54 = vpop.f32.mrf.mxu0 }
  0xd1   :  { %v161_v55 = vpop.f32.mrf.mxu1  ;;  %194 = vst.msk [vmem:[%s402_s3 + $0x8] sm:$0xff] %vm192_vm1, %v177_v50  ;;  %v182_v56 = vmax.f32 %v138_v52, 0.0  ;;  %v130_v58 = vadd.f32 %v213_v25, %v129_v54 }
  0xd2   :  { %202 = vst.msk [vmem:[%s402_s3 + $0x48] sm:$0xff] %vm192_vm1, %v185_v51  ;;  %v190_v57 = vmax.f32 %v170_v53, 0.0  ;;  %v162_v59 = vadd.f32 %v213_v25, %v161_v55  ;;  %v241_v60 = vpop.f32.mrf.mxu0 }
  0xd3   :  { %v249_v61 = vpop.f32.mrf.mxu1  ;;  %199 = vst.msk [vmem:[%s402_s3 + $0x30] sm:$0xff] %vm192_vm1, %v182_v56  ;;  %v180_v62 = vmax.f32 %v130_v58, 0.0  ;;  %v141_v0 = vadd.f32 %v241_v60, %v213_v25 }
  0xd4   :  { %207 = vst.msk [vmem:[%s402_s3 + $0x70] sm:$0xff] %vm192_vm1, %v190_v57  ;;  %v188_v63 = vmax.f32 %v162_v59, 0.0  ;;  %v173_v1 = vadd.f32 %v249_v61, %v213_v25  ;;  %v132_v2 = vpop.f32.mrf.mxu0 }
  0xd5   :  { %v164_v3 = vpop.f32.mrf.mxu1  ;;  %197 = vst.msk [vmem:[%s402_s3 + $0x20] sm:$0xff] %vm192_vm1, %v180_v62  ;;  %v183_v4 = vmax.f32 %v141_v0, 0.0  ;;  %v133_v6 = vadd.f32 %v213_v25, %v132_v2 }
  0xd6   :  { %205 = vst.msk [vmem:[%s402_s3 + $0x60] sm:$0xff] %vm192_vm1, %v188_v63  ;;  %v191_v5 = vmax.f32 %v173_v1, 0.0  ;;  %v165_v7 = vadd.f32 %v213_v25, %v164_v3 }
  0xd7   :  { %200 = vst.msk [vmem:[%s402_s3 + $0x38] sm:$0xff] %vm192_vm1, %v183_v4  ;;  %v181_v8 = vmax.f32 %v133_v6, 0.0 }
  0xd8   :  { %208 = vst.msk [vmem:[%s402_s3 + $0x78] sm:$0xff] %vm192_vm1, %v191_v5  ;;  %v189_v9 = vmax.f32 %v165_v7, 0.0 }
  0xd9   :  { %198 = vst.msk [vmem:[%s402_s3 + $0x28] sm:$0xff] %vm192_vm1, %v181_v8 }
  0xda   :  { %206 = vst.msk [vmem:[%s402_s3 + $0x68] sm:$0xff] %vm192_vm1, %v189_v9 }

// kernel: encoder_forward.6
= control target key start
LH: loop header
LB: loop body
LE: loop exit
PB: predicated region body
PF: predicated region fallthrough
CT: control target
= control target key end

     0   :  { %vm404_vm0 = vcmask 261120   ;;  %s717_s1 = inlined_call_operand.vmem [shape: bf16[512,32], index: 1, kind: input, shape index: {}]   ;;  %s718_s0 = inlined_call_operand.vmem [shape: f32[32,512], index: 0, kind: input, shape index: {}]   ;;  %s719_s2 = inlined_call_operand.vmem [shape: f32[1,32], index: 2, kind: input, shape index: {}]   ;;  %s720_s3 = inlined_call_operand.vmem [shape: f32[32,32], index: 3, kind: output, shape index: {}]  }
   0x1   :  { %v502_v0 = vld [vmem:[%s717_s1 + $0x78] sm:$0xff]   ;;  %v506_v4 = vld [vmem:[%s717_s1 + $0x70] sm:$0xff]   ;;  %v510_v8 = vld [vmem:[%s717_s1 + $0x68] sm:$0xff]  }
   0x2   :  { %v503_v1 = vld [vmem:[%s717_s1 + $0xf8] sm:$0xff]   ;;  %446 = vmatprep.subr.bf16.mxu0 %v502_v0  ;;  %v507_v5 = vld [vmem:[%s717_s1 + $0xf0] sm:$0xff]   ;;  %v511_v9 = vld [vmem:[%s717_s1 + $0xe8] sm:$0xff]  }
   0x3   :  { %v504_v2 = vld [vmem:[%s717_s1 + $0x38] sm:$0xff]   ;;  %474 = vmatprep.subr.bf16.mxu1 %v503_v1  ;;  %v508_v6 = vld [vmem:[%s717_s1 + $0x30] sm:$0xff]   ;;  %v512_v10 = vld [vmem:[%s717_s1 + $0x28] sm:$0xff]  }
   0x4   :  { %v505_v3 = vld [vmem:[%s717_s1 + $0xb8] sm:$0xff]   ;;  %447 = vmatpush3.bf16.msra.mxu0 %v504_v2  ;;  %v509_v7 = vld [vmem:[%s717_s1 + $0xb0] sm:$0xff]   ;;  %v513_v11 = vld [vmem:[%s717_s1 + $0xa8] sm:$0xff]  }
   0x5   :  { %475 = vmatpush3.bf16.msra.mxu1 %v505_v3  ;;  %448 = vmatprep.subr.bf16.mxu0 %v506_v4  ;;  %v514_v12 = vld [vmem:[%s717_s1 + $0x60] sm:$0xff]   ;;  %v518_v16 = vld [vmem:[%s717_s1 + $0x58] sm:$0xff]   ;;  %v522_v20 = vld [vmem:[%s717_s1 + $0x50] sm:$0xff]  }
   0x6   :  { %476 = vmatprep.subr.bf16.mxu1 %v507_v5  ;;  %v515_v13 = vld [vmem:[%s717_s1 + $0xe0] sm:$0xff]   ;;  %v519_v17 = vld [vmem:[%s717_s1 + $0xd8] sm:$0xff]   ;;  %v523_v21 = vld [vmem:[%s717_s1 + $0xd0] sm:$0xff]  }
   0x7   :  { %v516_v14 = vld [vmem:[%s717_s1 + $0x20] sm:$0xff]   ;;  %v520_v18 = vld [vmem:[%s717_s1 + $0x18] sm:$0xff]   ;;  %v524_v22 = vld [vmem:[%s717_s1 + $0x10] sm:$0xff]  }
   0x8   :  { %449 = vmatpush3.bf16.msra.mxu0 %v508_v6  ;;  %v517_v15 = vld [vmem:[%s717_s1 + $0xa0] sm:$0xff]   ;;  %v521_v19 = vld [vmem:[%s717_s1 + $0x98] sm:$0xff]   ;;  %v525_v23 = vld [vmem:[%s717_s1 + $0x90] sm:$0xff]  }
   0x9   :  { %477 = vmatpush3.bf16.msra.mxu1 %v509_v7  ;;  %450 = vmatprep.subr.bf16.mxu0 %v510_v8  ;;  %v526_v24 = vld [vmem:[%s717_s1 + $0x48] sm:$0xff]   ;;  %v530_v28 = vld [vmem:[%s717_s1 + $0x40] sm:$0xff]   ;;  %v18_v34 = vld [vmem:[%s718_s0 + $0x18] sm:$0xff] }
   0xa   :  { %478 = vmatprep.subr.bf16.mxu1 %v511_v9  ;;  %v527_v25 = vld [vmem:[%s717_s1 + $0xc8] sm:$0xff]   ;;  %v531_v29 = vld [vmem:[%s717_s1 + $0xc0] sm:$0xff]   ;;  %v22_v36 = vld [vmem:[%s718_s0 + $0x38] sm:$0xff] }
   0xb   :  { %v528_v26 = vld [vmem:[%s717_s1 + $0x8] sm:$0xff]   ;;  %v532_v30 = vld [vmem:[%s717_s1] sm:$0xff]   ;;  %v34_v39 = vpack.c.bf16 %v22_v36, %v18_v34  ;;  %v17_v41 = vld [vmem:[%s718_s0 + $0x10] sm:$0xff] }
   0xc   :  { %451 = vmatpush3.bf16.msra.mxu0 %v512_v10  ;;  %v529_v27 = vld [vmem:[%s717_s1 + $0x88] sm:$0xff]   ;;  %v533_v31 = vld [vmem:[%s717_s1 + $0x80] sm:$0xff]   ;;  %v21_v42 = vld [vmem:[%s718_s0 + $0x30] sm:$0xff] }
   0xd   :  { %479 = vmatpush3.bf16.msra.mxu1 %v513_v11  ;;  %452 = vmatprep.subr.bf16.mxu0 %v514_v12  ;;  %v16_v32 = vld [vmem:[%s718_s0 + $0x8] sm:$0xff]  ;;  %v15_v37 = vld [vmem:[%s718_s0] sm:$0xff]  ;;  %v33_v44 = vpack.c.bf16 %v21_v42, %v17_v41  ;;  %v26_v46 = vld [vmem:[%s718_s0 + $0x58] sm:$0xff] }
   0xe   :  { %480 = vmatprep.subr.bf16.mxu1 %v515_v13  ;;  %v20_v33 = vld [vmem:[%s718_s0 + $0x28] sm:$0xff]  ;;  %v19_v38 = vld [vmem:[%s718_s0 + $0x20] sm:$0xff]  ;;  %v30_v47 = vld [vmem:[%s718_s0 + $0x78] sm:$0xff]  ;;  %383 = vmatprep.mubr.bf16.mxu1 %v34_v39 }
   0xf   :  { %v32_v35 = vpack.c.bf16 %v20_v33, %v16_v32  ;;  %v31_v40 = vpack.c.bf16 %v19_v38, %v15_v37  ;;  %v24_v43 = vld [vmem:[%s718_s0 + $0x48] sm:$0xff]  ;;  %v38_v49 = vpack.c.bf16 %v30_v47, %v26_v46  ;;  %v23_v50 = vld [vmem:[%s718_s0 + $0x40] sm:$0xff]  ;;  %v25_v52 = vld [vmem:[%s718_s0 + $0x50] sm:$0xff] }
  0x10   :  { %453 = vmatpush3.bf16.msra.mxu0 %v516_v14  ;;  %v28_v45 = vld [vmem:[%s718_s0 + $0x68] sm:$0xff]  ;;  %v27_v51 = vld [vmem:[%s718_s0 + $0x60] sm:$0xff]  ;;  %v29_v53 = vld [vmem:[%s718_s0 + $0x70] sm:$0xff] }
  0x11   :  { %481 = vmatpush3.bf16.msra.mxu1 %v517_v15  ;;  %454 = vmatprep.subr.bf16.mxu0 %v518_v16  ;;  %v36_v48 = vpack.c.bf16 %v28_v45, %v24_v43  ;;  %v35_v54 = vpack.c.bf16 %v27_v51, %v23_v50  ;;  %v37_v55 = vpack.c.bf16 %v29_v53, %v25_v52  ;;  %v413_v58 = vld [vmem:[%s719_s2] ss:$0 sm:$0xff] }
  0x12   :  { %482 = vmatprep.subr.bf16.mxu1 %v519_v17  ;;  %334 = vmatprep.mubr.bf16.mxu0 %v32_v35 }
  0x14   :  { %455 = vmatpush3.bf16.msra.mxu0 %v520_v18 }
  0x15   :  { %483 = vmatpush3.bf16.msra.mxu1 %v521_v19  ;;  %456 = vmatprep.subr.bf16.mxu0 %v522_v20 }
  0x16   :  { %484 = vmatprep.subr.bf16.mxu1 %v523_v21 }
  0x18   :  { %457 = vmatpush3.bf16.msra.mxu0 %v524_v22 }
  0x19   :  { %485 = vmatpush3.bf16.msra.mxu1 %v525_v23  ;;  %458 = vmatprep.subr.bf16.mxu0 %v526_v24 }
  0x1a   :  { %486 = vmatprep.subr.bf16.mxu1 %v527_v25 }
  0x1c   :  { %459 = vmatpush3.bf16.msra.mxu0 %v528_v26 }
  0x1d   :  { %487 = vmatpush3.bf16.msra.mxu1 %v529_v27  ;;  %460 = vmatprep.subr.bf16.mxu0 %v530_v28 }
  0x1e   :  { %488 = vmatprep.subr.bf16.mxu1 %v531_v29 }
  0x20   :  { %461 = vmatpush3.bf16.msra.mxu0 %v532_v30 }
  0x21   :  { %489 = vmatpush3.bf16.msra.mxu1 %v533_v31 }
  0x23   :  { %335 = vmatmul.mubr.bf16.vlgmr.msra.gmra.mxu0 %v31_v40 }
  0x24   :  { %384 = vmatmul.mubr.bf16.vlgmr.msra.gmra.mxu1 %v33_v44  ;;  %342 = vmatprep.mubr.bf16.mxu0 %v36_v48 }
  0x25   :  { %391 = vmatprep.mubr.bf16.mxu1 %v38_v49 }
  0x2b   :  { %343 = vmatmul.mubr.bf16.gmra.mxu0 %v35_v54 }
  0x2c   :  { %392 = vmatmul.mubr.bf16.gmra.mxu1 %v37_v55 }
  0xe3   :  { %v462_v56 = vpop.f32.mrf.mxu0 }
  0xe4   :  { %v490_v57 = vpop.f32.mrf.mxu1 }
  0xe5   :  { %v463_v59 = vpop.f32.mrf.mxu0 }
  0xe6   :  { %v464_v60 = vadd.f32 %v463_v59, %v462_v56  ;;  %v491_v61 = vpop.f32.mrf.mxu1 }
  0xe7   :  { %v465_v62 = vpop.f32.mrf.mxu0  ;;  %v492_v0 = vadd.f32 %v491_v61, %v490_v57 }
  0xe8   :  { %v337_v63 = vadd.f32 %v464_v60, %v413_v58  ;;  %v493_v1 = vpop.f32.mrf.mxu1 }
  0xe9   :  { %v466_v2 = vpop.f32.mrf.mxu0 }
  0xea   :  { %v386_v3 = vadd.f32 %v492_v0, %v337_v63  ;;  %v467_v4 = vadd.f32 %v466_v2, %v465_v62  ;;  %v494_v5 = vpop.f32.mrf.mxu1 }
  0xeb   :  { %v468_v6 = vpop.f32.mrf.mxu0  ;;  %v495_v9 = vadd.f32 %v494_v5, %v493_v1 }
  0xec   :  { %v400_v7 = vmax.f32 %v386_v3, 0.0  ;;  %v340_v8 = vadd.f32 %v467_v4, %v413_v58  ;;  %v496_v10 = vpop.f32.mrf.mxu1 }
  0xed   :  { %v469_v11 = vpop.f32.mrf.mxu0 }
  0xee   :  { %405 = vst.msk [vmem:[%s720_s3] sm:$0xff] %vm404_vm0, %v400_v7  ;;  %v389_v12 = vadd.f32 %v495_v9, %v340_v8  ;;  %v470_v13 = vadd.f32 %v469_v11, %v468_v6  ;;  %v497_v14 = vpop.f32.mrf.mxu1 }
  0xef   :  { %v471_v15 = vpop.f32.mrf.mxu0  ;;  %v498_v18 = vadd.f32 %v497_v14, %v496_v10 }
  0xf0   :  { %v401_v16 = vmax.f32 %v389_v12, 0.0  ;;  %v345_v17 = vadd.f32 %v470_v13, %v413_v58  ;;  %v499_v19 = vpop.f32.mrf.mxu1 }
  0xf1   :  { %v472_v20 = vpop.f32.mrf.mxu0 }
  0xf2   :  { %406 = vst.msk [vmem:[%s720_s3 + $0x8] sm:$0xff] %vm404_vm0, %v401_v16  ;;  %v394_v21 = vadd.f32 %v498_v18, %v345_v17  ;;  %v473_v22 = vadd.f32 %v472_v20, %v471_v15  ;;  %v500_v23 = vpop.f32.mrf.mxu1 }
  0xf3   :  { %v501_v26 = vadd.f32 %v500_v23, %v499_v19 }
  0xf4   :  { %v402_v24 = vmax.f32 %v394_v21, 0.0  ;;  %v348_v25 = vadd.f32 %v473_v22, %v413_v58 }
  0xf6   :  { %407 = vst.msk [vmem:[%s720_s3 + $0x10] sm:$0xff] %vm404_vm0, %v402_v24  ;;  %v397_v27 = vadd.f32 %v501_v26, %v348_v25 }
  0xf8   :  { %v403_v28 = vmax.f32 %v397_v27, 0.0 }
  0xfa   :  { %408 = vst.msk [vmem:[%s720_s3 + $0x18] sm:$0xff] %vm404_vm0, %v403_v28 }

// kernel: encoder_forward.7
= control target key start
LH: loop header
LB: loop body
LE: loop exit
PB: predicated region body
PF: predicated region fallthrough
CT: control target
= control target key end

     0   :  { %vm367_vm0 = vcmask 523264   ;;  %s616_s1 = inlined_call_operand.vmem [shape: bf16[512,64], index: 1, kind: input, shape index: {}]   ;;  %s617_s0 = inlined_call_operand.vmem [shape: f32[8,512], index: 0, kind: input, shape index: {}]   ;;  %s618_s2 = inlined_call_operand.vmem [shape: f32[1,64], index: 2, kind: input, shape index: {}]   ;;  %s619_s3 = inlined_call_operand.vmem [shape: f32[8,64], index: 3, kind: output, shape index: {}]  }
   0x1   :  { %v450_v0 = vld [vmem:[%s616_s1 + $0x78] sm:$0xff]   ;;  %v454_v4 = vld [vmem:[%s616_s1 + $0x70] sm:$0xff]   ;;  %v458_v8 = vld [vmem:[%s616_s1 + $0x68] sm:$0xff]  }
   0x2   :  { %v451_v1 = vld [vmem:[%s616_s1 + $0xf8] sm:$0xff]   ;;  %406 = vmatprep.subr.bf16.mxu0 %v450_v0  ;;  %v455_v5 = vld [vmem:[%s616_s1 + $0xf0] sm:$0xff]   ;;  %v459_v9 = vld [vmem:[%s616_s1 + $0xe8] sm:$0xff]  }
   0x3   :  { %v452_v2 = vld [vmem:[%s616_s1 + $0x38] sm:$0xff]   ;;  %428 = vmatprep.subr.bf16.mxu1 %v451_v1  ;;  %v456_v6 = vld [vmem:[%s616_s1 + $0x30] sm:$0xff]   ;;  %v460_v10 = vld [vmem:[%s616_s1 + $0x28] sm:$0xff]  }
   0x4   :  { %v453_v3 = vld [vmem:[%s616_s1 + $0xb8] sm:$0xff]   ;;  %407 = vmatpush3.bf16.msra.mxu0 %v452_v2  ;;  %v457_v7 = vld [vmem:[%s616_s1 + $0xb0] sm:$0xff]   ;;  %v461_v11 = vld [vmem:[%s616_s1 + $0xa8] sm:$0xff]  }
   0x5   :  { %429 = vmatpush3.bf16.msra.mxu1 %v453_v3  ;;  %408 = vmatprep.subr.bf16.mxu0 %v454_v4  ;;  %v462_v12 = vld [vmem:[%s616_s1 + $0x60] sm:$0xff]   ;;  %v466_v16 = vld [vmem:[%s616_s1 + $0x58] sm:$0xff]   ;;  %v470_v20 = vld [vmem:[%s616_s1 + $0x50] sm:$0xff]  }
   0x6   :  { %430 = vmatprep.subr.bf16.mxu1 %v455_v5  ;;  %v463_v13 = vld [vmem:[%s616_s1 + $0xe0] sm:$0xff]   ;;  %v467_v17 = vld [vmem:[%s616_s1 + $0xd8] sm:$0xff]   ;;  %v471_v21 = vld [vmem:[%s616_s1 + $0xd0] sm:$0xff]  }
   0x7   :  { %v464_v14 = vld [vmem:[%s616_s1 + $0x20] sm:$0xff]   ;;  %v468_v18 = vld [vmem:[%s616_s1 + $0x18] sm:$0xff]   ;;  %v472_v22 = vld [vmem:[%s616_s1 + $0x10] sm:$0xff]  }
   0x8   :  { %409 = vmatpush3.bf16.msra.mxu0 %v456_v6  ;;  %v465_v15 = vld [vmem:[%s616_s1 + $0xa0] sm:$0xff]   ;;  %v469_v19 = vld [vmem:[%s616_s1 + $0x98] sm:$0xff]   ;;  %v473_v23 = vld [vmem:[%s616_s1 + $0x90] sm:$0xff]  }
   0x9   :  { %431 = vmatpush3.bf16.msra.mxu1 %v457_v7  ;;  %410 = vmatprep.subr.bf16.mxu0 %v458_v8  ;;  %v474_v24 = vld [vmem:[%s616_s1 + $0x48] sm:$0xff]   ;;  %v478_v28 = vld [vmem:[%s616_s1 + $0x40] sm:$0xff]   ;;  %v18_v33 = vld [vmem:[%s617_s0 + $0x18] sm:$0xff] }
   0xa   :  { %432 = vmatprep.subr.bf16.mxu1 %v459_v9  ;;  %v475_v25 = vld [vmem:[%s616_s1 + $0xc8] sm:$0xff]   ;;  %v479_v29 = vld [vmem:[%s616_s1 + $0xc0] sm:$0xff]   ;;  %v22_v36 = vpack.c.bf16 %v18_v33, %v18_v33  ;;  %v17_v38 = vld [vmem:[%s617_s0 + $0x10] sm:$0xff] }
   0xb   :  { %v476_v26 = vld [vmem:[%s616_s1 + $0x8] sm:$0xff]   ;;  %v480_v30 = vld [vmem:[%s616_s1] sm:$0xff]   ;;  %v21_v39 = vpack.c.bf16 %v17_v38, %v17_v38 }
   0xc   :  { %411 = vmatpush3.bf16.msra.mxu0 %v460_v10  ;;  %v477_v27 = vld [vmem:[%s616_s1 + $0x88] sm:$0xff]   ;;  %v481_v31 = vld [vmem:[%s616_s1 + $0x80] sm:$0xff]   ;;  %358 = vmatprep.mubr.bf16.mxu1 %v22_v36 }
   0xd   :  { %433 = vmatpush3.bf16.msra.mxu1 %v461_v11  ;;  %412 = vmatprep.subr.bf16.mxu0 %v462_v12  ;;  %v16_v32 = vld [vmem:[%s617_s0 + $0x8] sm:$0xff]  ;;  %v15_v34 = vld [vmem:[%s617_s0] sm:$0xff] }
   0xe   :  { %434 = vmatprep.subr.bf16.mxu1 %v463_v13  ;;  %v20_v35 = vpack.c.bf16 %v16_v32, %v16_v32  ;;  %v19_v37 = vpack.c.bf16 %v15_v34, %v15_v34  ;;  %v373_v42 = vld [vmem:[%s618_s2] ss:$0 sm:$0xff] }
  0x10   :  { %413 = vmatpush3.bf16.msra.mxu0 %v464_v14  ;;  %318 = vmatprep.mubr.bf16.mxu0 %v20_v35 }
  0x11   :  { %435 = vmatpush3.bf16.msra.mxu1 %v465_v15  ;;  %414 = vmatprep.subr.bf16.mxu0 %v466_v16 }
  0x12   :  { %436 = vmatprep.subr.bf16.mxu1 %v467_v17 }
  0x14   :  { %415 = vmatpush3.bf16.msra.mxu0 %v468_v18 }
  0x15   :  { %437 = vmatpush3.bf16.msra.mxu1 %v469_v19  ;;  %416 = vmatprep.subr.bf16.mxu0 %v470_v20 }
  0x16   :  { %438 = vmatprep.subr.bf16.mxu1 %v471_v21 }
  0x18   :  { %417 = vmatpush3.bf16.msra.mxu0 %v472_v22 }
  0x19   :  { %439 = vmatpush3.bf16.msra.mxu1 %v473_v23  ;;  %418 = vmatprep.subr.bf16.mxu0 %v474_v24 }
  0x1a   :  { %440 = vmatprep.subr.bf16.mxu1 %v475_v25 }
  0x1c   :  { %419 = vmatpush3.bf16.msra.mxu0 %v476_v26 }
  0x1d   :  { %441 = vmatpush3.bf16.msra.mxu1 %v477_v27  ;;  %420 = vmatprep.subr.bf16.mxu0 %v478_v28 }
  0x1e   :  { %442 = vmatprep.subr.bf16.mxu1 %v479_v29 }
  0x20   :  { %421 = vmatpush3.bf16.msra.mxu0 %v480_v30 }
  0x21   :  { %443 = vmatpush3.bf16.msra.mxu1 %v481_v31 }
  0x23   :  { %319 = vmatmul.mubr.bf16.vlgmr.msra.gmra.mxu0 %v19_v37 }
  0x24   :  { %359 = vmatmul.mubr.bf16.vlgmr.msra.gmra.mxu1 %v21_v39 }
  0xe3   :  { %v422_v40 = vpop.f32.mrf.mxu0 }
  0xe4   :  { %v444_v41 = vpop.f32.mrf.mxu1 }
  0xe5   :  { %v423_v43 = vpop.f32.mrf.mxu0 }
  0xe6   :  { %v445_v44 = vpop.f32.mrf.mxu1  ;;  %v424_v45 = vadd.f32 %v423_v43, %v422_v40 }
  0xe7   :  { %v425_v46 = vpop.f32.mrf.mxu0  ;;  %v446_v49 = vadd.f32 %v445_v44, %v444_v41 }
  0xe8   :  { %v447_v47 = vpop.f32.mrf.mxu1  ;;  %v321_v48 = vadd.f32 %v424_v45, %v373_v42 }
  0xe9   :  { %v426_v50 = vpop.f32.mrf.mxu0 }
  0xea   :  { %v448_v51 = vpop.f32.mrf.mxu1  ;;  %v361_v52 = vadd.f32 %v446_v49, %v321_v48 }
  0xec   :  { %v366_v53 = vmax.f32 %v361_v52, 0.0 }
  0xee   :  { %368 = vst.msk [vmem:[%s619_s3] sm:$0xff] %vm367_vm0, %v366_v53 }

// kernel: encoder_forward.8
= control target key start
LH: loop header
LB: loop body
LE: loop exit
PB: predicated region body
PF: predicated region fallthrough
CT: control target
= control target key end

     0   :  { %v975_v22 = vmov 1983009808   ;;  %v23_v24 = vlaneseq  ;;  %vm749_vm0 = vcmask 517120   ;;  %s1212_s1 = inlined_call_operand.vmem [shape: bf16[1024,64], index: 1, kind: input, shape index: {}]   ;;  %s1213_s0 = inlined_call_operand.vmem [shape: f32[2,1024], index: 0, kind: input, shape index: {}]   ;;  %s1214_s2 = inlined_call_operand.vmem [shape: f32[1,64], index: 2, kind: input, shape index: {}]   ;;  %s1215_s3 = inlined_call_operand.vmem [shape: f32[2,64], index: 3, kind: output, shape index: {}]  }
   0x1   :  { %v909_v0 = vld [vmem:[%s1212_s1 + $0x78] sm:$0xff]   ;;  %v913_v4 = vld [vmem:[%s1212_s1 + $0x70] sm:$0xff]   ;;  %v917_v8 = vld [vmem:[%s1212_s1 + $0x68] sm:$0xff]   ;;  %v21_v23 = vunpack.c.l.s4 %v975_v22 }
   0x2   :  { %v910_v1 = vld [vmem:[%s1212_s1 + $0xf8] sm:$0xff]   ;;  %820 = vmatprep.subr.bf16.mxu0 %v909_v0  ;;  %v914_v5 = vld [vmem:[%s1212_s1 + $0xf0] sm:$0xff]   ;;  %v918_v9 = vld [vmem:[%s1212_s1 + $0xe8] sm:$0xff]   ;;  %v24_v30 = vshrl.u32 %v23_v24, 7 }
   0x3   :  { %v911_v2 = vld [vmem:[%s1212_s1 + $0x38] sm:$0xff]   ;;  %842 = vmatprep.subr.bf16.mxu1 %v910_v1  ;;  %v915_v6 = vld [vmem:[%s1212_s1 + $0x30] sm:$0xff]   ;;  %v919_v10 = vld [vmem:[%s1212_s1 + $0x28] sm:$0xff]   ;;  %v22_v29 = vunpack.c.0.s8 %v21_v23 }
   0x4   :  { %v912_v3 = vld [vmem:[%s1212_s1 + $0xb8] sm:$0xff]   ;;  %821 = vmatpush3.bf16.msra.mxu0 %v911_v2  ;;  %v916_v7 = vld [vmem:[%s1212_s1 + $0xb0] sm:$0xff]   ;;  %v920_v11 = vld [vmem:[%s1212_s1 + $0xa8] sm:$0xff]  }
   0x5   :  { %843 = vmatpush3.bf16.msra.mxu1 %v912_v3  ;;  %822 = vmatprep.subr.bf16.mxu0 %v913_v4  ;;  %v921_v12 = vld [vmem:[%s1212_s1 + $0x60] sm:$0xff]   ;;  %v925_v16 = vld [vmem:[%s1212_s1 + $0x58] sm:$0xff]   ;;  %v929_v20 = vld [vmem:[%s1212_s1 + $0x50] sm:$0xff]   ;;  %v25_v35 = vsub.s32 %v22_v29, %v24_v30 }
   0x6   :  { %844 = vmatprep.subr.bf16.mxu1 %v914_v5  ;;  %v922_v13 = vld [vmem:[%s1212_s1 + $0xe0] sm:$0xff]   ;;  %v926_v17 = vld [vmem:[%s1212_s1 + $0xd8] sm:$0xff]   ;;  %v930_v21 = vld [vmem:[%s1212_s1 + $0xd0] sm:$0xff]  }
   0x7   :  { %v923_v14 = vld [vmem:[%s1212_s1 + $0x20] sm:$0xff]   ;;  %v927_v18 = vld [vmem:[%s1212_s1 + $0x18] sm:$0xff]   ;;  %v931_v25 = vld [vmem:[%s1212_s1 + $0x10] sm:$0xff]  }
   0x8   :  { %823 = vmatpush3.bf16.msra.mxu0 %v915_v6  ;;  %v924_v15 = vld [vmem:[%s1212_s1 + $0xa0] sm:$0xff]   ;;  %v928_v19 = vld [vmem:[%s1212_s1 + $0x98] sm:$0xff]   ;;  %v932_v26 = vld [vmem:[%s1212_s1 + $0x90] sm:$0xff]  }
   0x9   :  { %845 = vmatpush3.bf16.msra.mxu1 %v916_v7  ;;  %824 = vmatprep.subr.bf16.mxu0 %v917_v8  ;;  %v933_v27 = vld [vmem:[%s1212_s1 + $0x48] sm:$0xff]   ;;  %v937_v33 = vld [vmem:[%s1212_s1 + $0x40] sm:$0xff]   ;;  %v943_v43 = vld [vmem:[%s1212_s1 + $0x178] sm:$0xff]  }
   0xa   :  { %846 = vmatprep.subr.bf16.mxu1 %v918_v9  ;;  %v934_v28 = vld [vmem:[%s1212_s1 + $0xc8] sm:$0xff]   ;;  %v938_v34 = vld [vmem:[%s1212_s1 + $0xc0] sm:$0xff]   ;;  %v944_v45 = vld [vmem:[%s1212_s1 + $0x1f8] sm:$0xff]  }
   0xb   :  { %v935_v31 = vld [vmem:[%s1212_s1 + $0x8] sm:$0xff]   ;;  %v939_v36 = vld [vmem:[%s1212_s1] sm:$0xff]   ;;  %v945_v53 = vld [vmem:[%s1212_s1 + $0x138] sm:$0xff]  }
   0xc   :  { %825 = vmatpush3.bf16.msra.mxu0 %v919_v10  ;;  %v936_v32 = vld [vmem:[%s1212_s1 + $0x88] sm:$0xff]   ;;  %v940_v37 = vld [vmem:[%s1212_s1 + $0x80] sm:$0xff]   ;;  %v947_v55 = vld [vmem:[%s1212_s1 + $0x170] sm:$0xff]  }
   0xd   :  { %847 = vmatpush3.bf16.msra.mxu1 %v920_v11  ;;  %826 = vmatprep.subr.bf16.mxu0 %v921_v12  ;;  %v15_v38 = vld [vmem:[%s1213_s0] sm:$0xff]  ;;  %v16_v39 = vld [vmem:[%s1213_s0 + $0x8] sm:$0xff]  ;;  %v946_v58 = vld [vmem:[%s1212_s1 + $0x1b8] sm:$0xff]  }
   0xe   :  { %848 = vmatprep.subr.bf16.mxu1 %v922_v13  ;;  %v26_v40 = vrot.slane %v15_v38, %v25_v35  ;;  %v36_v41 = vcombine.high %v16_v39, %v16_v39  ;;  %v19_v42 = vcombine.high %v15_v38, %v15_v38  ;;  %v1101_v44 = vrot.slane %v16_v39, %v25_v35  ;;  %v948_v60 = vld [vmem:[%s1212_s1 + $0x1f0] sm:$0xff]   ;;  %v951_v63 = vld [vmem:[%s1212_s1 + $0x168] sm:$0xff]   ;;  %v955_v3 = vld [vmem:[%s1212_s1 + $0x160] sm:$0xff]  }
   0xf   :  { %v949_v62 = vld [vmem:[%s1212_s1 + $0x130] sm:$0xff]   ;;  %v952_v1 = vld [vmem:[%s1212_s1 + $0x1e8] sm:$0xff]   ;;  %v956_v5 = vld [vmem:[%s1212_s1 + $0x1e0] sm:$0xff]  }
  0x10   :  { %827 = vmatpush3.bf16.msra.mxu0 %v923_v14  ;;  %v34_v46 = vcombine.high %v26_v40, %v26_v40  ;;  %v33_v47 = vrot.slane %v19_v42, %v25_v35  ;;  %v51_v48 = vcombine.high %v1101_v44, %v1101_v44  ;;  %v61_v49 = vpack.c.bf16 %v26_v40, %v26_v40  ;;  %v950_v0 = vld [vmem:[%s1212_s1 + $0x1b0] sm:$0xff]   ;;  %v953_v2 = vld [vmem:[%s1212_s1 + $0x128] sm:$0xff]   ;;  %v957_v6 = vld [vmem:[%s1212_s1 + $0x120] sm:$0xff]  }
  0x11   :  { %849 = vmatpush3.bf16.msra.mxu1 %v924_v15  ;;  %828 = vmatprep.subr.bf16.mxu0 %v925_v16  ;;  %v1108_v50 = vrot.slane %v36_v41, %v25_v35  ;;  %v954_v4 = vld [vmem:[%s1212_s1 + $0x1a8] sm:$0xff]   ;;  %v959_v7 = vld [vmem:[%s1212_s1 + $0x158] sm:$0xff]   ;;  %v958_v8 = vld [vmem:[%s1212_s1 + $0x1a0] sm:$0xff]   ;;  %v65_v24 = vpack.c.bf16 %v1101_v44, %v1101_v44 }
  0x12   :  { %850 = vmatprep.subr.bf16.mxu1 %v926_v17  ;;  %v62_v51 = vpack.c.bf16 %v34_v46, %v34_v46  ;;  %v35_v52 = vcombine.high %v33_v47, %v33_v47  ;;  %v63_v54 = vpack.c.bf16 %v33_v47, %v33_v47  ;;  %v66_v59 = vpack.c.bf16 %v51_v48, %v51_v48  ;;  %v960_v9 = vld [vmem:[%s1212_s1 + $0x1d8] sm:$0xff]   ;;  %v963_v11 = vld [vmem:[%s1212_s1 + $0x150] sm:$0xff]   ;;  %v967_v15 = vld [vmem:[%s1212_s1 + $0x148] sm:$0xff]  }
  0x13   :  { %v52_v56 = vcombine.high %v1108_v50, %v1108_v50  ;;  %v961_v10 = vld [vmem:[%s1212_s1 + $0x118] sm:$0xff]   ;;  %v964_v13 = vld [vmem:[%s1212_s1 + $0x1d0] sm:$0xff]   ;;  %v968_v17 = vld [vmem:[%s1212_s1 + $0x1c8] sm:$0xff]  }
  0x14   :  { %829 = vmatpush3.bf16.msra.mxu0 %v927_v18  ;;  %620 = vmatprep.mubr.bf16.mxu0 %v62_v51  ;;  %v64_v57 = vpack.c.bf16 %v35_v52, %v35_v52  ;;  %v962_v12 = vld [vmem:[%s1212_s1 + $0x198] sm:$0xff]   ;;  %v965_v14 = vld [vmem:[%s1212_s1 + $0x110] sm:$0xff]   ;;  %v969_v18 = vld [vmem:[%s1212_s1 + $0x108] sm:$0xff]  }
  0x15   :  { %851 = vmatpush3.bf16.msra.mxu1 %v928_v19  ;;  %830 = vmatprep.subr.bf16.mxu0 %v929_v20  ;;  %v68_v61 = vpack.c.bf16 %v52_v56, %v52_v56  ;;  %v966_v16 = vld [vmem:[%s1212_s1 + $0x190] sm:$0xff]   ;;  %v971_v19 = vld [vmem:[%s1212_s1 + $0x140] sm:$0xff]   ;;  %v970_v20 = vld [vmem:[%s1212_s1 + $0x188] sm:$0xff]  }
  0x16   :  { %852 = vmatprep.subr.bf16.mxu1 %v930_v21  ;;  %660 = vmatprep.mubr.bf16.mxu1 %v64_v57  ;;  %v972_v21 = vld [vmem:[%s1212_s1 + $0x1c0] sm:$0xff]  }
  0x17   :  { %v973_v22 = vld [vmem:[%s1212_s1 + $0x100] sm:$0xff]  }
  0x18   :  { %831 = vmatpush3.bf16.msra.mxu0 %v931_v25  ;;  %v974_v23 = vld [vmem:[%s1212_s1 + $0x180] sm:$0xff]   ;;  %v67_v25 = vpack.c.bf16 %v1108_v50, %v1108_v50 }
  0x19   :  { %853 = vmatpush3.bf16.msra.mxu1 %v932_v26  ;;  %832 = vmatprep.subr.bf16.mxu0 %v933_v27  ;;  %v755_v35 = vld [vmem:[%s1214_s2] ss:$0 sm:$0xff] }
  0x1a   :  { %854 = vmatprep.subr.bf16.mxu1 %v934_v28 }
  0x1c   :  { %833 = vmatpush3.bf16.msra.mxu0 %v935_v31 }
  0x1d   :  { %855 = vmatpush3.bf16.msra.mxu1 %v936_v32  ;;  %834 = vmatprep.subr.bf16.mxu0 %v937_v33 }
  0x1e   :  { %856 = vmatprep.subr.bf16.mxu1 %v938_v34 }
  0x20   :  { %835 = vmatpush3.bf16.msra.mxu0 %v939_v36 }
  0x21   :  { %857 = vmatpush3.bf16.msra.mxu1 %v940_v37  ;;  %864 = vmatprep.subr.bf16.mxu0 %v943_v43 }
  0x22   :  { %886 = vmatprep.subr.bf16.mxu1 %v944_v45 }
  0x23   :  { %621 = vmatmul.mubr.bf16.vlgmr.msra.gmra.mxu0 %v61_v49 }
  0x24   :  { %865 = vmatpush3.bf16.msra.mxu0 %v945_v53  ;;  %661 = vmatmul.mubr.bf16.vlgmr.msra.gmra.mxu1 %v63_v54 }
  0x25   :  { %866 = vmatprep.subr.bf16.mxu0 %v947_v55  ;;  %887 = vmatpush3.bf16.msra.mxu1 %v946_v58 }
  0x26   :  { %700 = vmatprep.mubr.bf16.mxu0 %v66_v59  ;;  %888 = vmatprep.subr.bf16.mxu1 %v948_v60 }
  0x27   :  { %740 = vmatprep.mubr.bf16.mxu1 %v68_v61 }
  0x28   :  { %867 = vmatpush3.bf16.msra.mxu0 %v949_v62 }
  0x29   :  { %868 = vmatprep.subr.bf16.mxu0 %v951_v63  ;;  %889 = vmatpush3.bf16.msra.mxu1 %v950_v0 }
  0x2a   :  { %890 = vmatprep.subr.bf16.mxu1 %v952_v1 }
  0x2c   :  { %869 = vmatpush3.bf16.msra.mxu0 %v953_v2 }
  0x2d   :  { %870 = vmatprep.subr.bf16.mxu0 %v955_v3  ;;  %891 = vmatpush3.bf16.msra.mxu1 %v954_v4 }
  0x2e   :  { %892 = vmatprep.subr.bf16.mxu1 %v956_v5 }
  0x30   :  { %871 = vmatpush3.bf16.msra.mxu0 %v957_v6 }
  0x31   :  { %872 = vmatprep.subr.bf16.mxu0 %v959_v7  ;;  %893 = vmatpush3.bf16.msra.mxu1 %v958_v8 }
  0x32   :  { %894 = vmatprep.subr.bf16.mxu1 %v960_v9 }
  0x34   :  { %873 = vmatpush3.bf16.msra.mxu0 %v961_v10 }
  0x35   :  { %874 = vmatprep.subr.bf16.mxu0 %v963_v11  ;;  %895 = vmatpush3.bf16.msra.mxu1 %v962_v12 }
  0x36   :  { %896 = vmatprep.subr.bf16.mxu1 %v964_v13 }
  0x38   :  { %875 = vmatpush3.bf16.msra.mxu0 %v965_v14 }
  0x39   :  { %876 = vmatprep.subr.bf16.mxu0 %v967_v15  ;;  %897 = vmatpush3.bf16.msra.mxu1 %v966_v16 }
  0x3a   :  { %898 = vmatprep.subr.bf16.mxu1 %v968_v17 }
  0x3c   :  { %877 = vmatpush3.bf16.msra.mxu0 %v969_v18 }
  0x3d   :  { %878 = vmatprep.subr.bf16.mxu0 %v971_v19  ;;  %899 = vmatpush3.bf16.msra.mxu1 %v970_v20 }
  0x3e   :  { %900 = vmatprep.subr.bf16.mxu1 %v972_v21 }
  0x40   :  { %879 = vmatpush3.bf16.msra.mxu0 %v973_v22 }
  0x41   :  { %901 = vmatpush3.bf16.msra.mxu1 %v974_v23 }
  0x43   :  { %701 = vmatmul.mubr.bf16.vlgmr.msra.gmra.mxu0 %v65_v24 }
  0x44   :  { %741 = vmatmul.mubr.bf16.vlgmr.msra.gmra.mxu1 %v67_v25 }
  0xe3   :  { %v836_v26 = vpop.f32.mrf.mxu0 }
  0xe4   :  { %v858_v27 = vpop.f32.mrf.mxu1 }
  0xe5   :  { %v837_v28 = vpop.f32.mrf.mxu0 }
  0xe6   :  { %v859_v29 = vpop.f32.mrf.mxu1  ;;  %v838_v34 = vadd.f32 %v837_v28, %v836_v26 }
  0xe7   :  { %v839_v30 = vpop.f32.mrf.mxu0  ;;  %v860_v37 = vadd.f32 %v859_v29, %v858_v27 }
  0xe8   :  { %v861_v31 = vpop.f32.mrf.mxu1  ;;  %v623_v36 = vadd.f32 %v838_v34, %v755_v35 }
  0xe9   :  { %v840_v32 = vpop.f32.mrf.mxu0 }
  0xea   :  { %v862_v33 = vpop.f32.mrf.mxu1  ;;  %v663_v41 = vadd.f32 %v860_v37, %v623_v36 }
 0x103   :  { %v880_v38 = vpop.f32.mrf.mxu0 }
 0x104   :  { %v902_v39 = vpop.f32.mrf.mxu1 }
 0x105   :  { %v881_v40 = vpop.f32.mrf.mxu0 }
 0x106   :  { %v882_v42 = vadd.f32 %v881_v40, %v880_v38  ;;  %v903_v43 = vpop.f32.mrf.mxu1 }
 0x107   :  { %v883_v44 = vpop.f32.mrf.mxu0  ;;  %v904_v46 = vadd.f32 %v903_v43, %v902_v39 }
 0x108   :  { %v703_v45 = vadd.f32 %v882_v42, %v663_v41  ;;  %v905_v47 = vpop.f32.mrf.mxu1 }
 0x109   :  { %v884_v48 = vpop.f32.mrf.mxu0 }
 0x10a   :  { %v743_v49 = vadd.f32 %v904_v46, %v703_v45  ;;  %v906_v50 = vpop.f32.mrf.mxu1 }
 0x10c   :  { %v748_v51 = vmax.f32 %v743_v49, 0.0 }
 0x10e   :  { %750 = vst.msk [vmem:[%s1215_s3] sm:$0x3] %vm749_vm0, %v748_v51 }

// kernel: encoder_forward.9
= control target key start
LH: loop header
LB: loop body
LE: loop exit
PB: predicated region body
PF: predicated region fallthrough
CT: control target
= control target key end

     0   :  { %v1265_v3 = vmov 0   ;;  %vm343_vm0 = vcmask 523264   ;;  %vm1007_vm1 = vcmask 15360   ;;  %s1756_s0 = inlined_call_operand.vmem [shape: f32[64,2], index: 0, kind: input, shape index: {}]   ;;  %s1757_s2 = inlined_call_operand.vmem [shape: f32[256,1], index: 2, kind: input, shape index: {}]   ;;  %s1758_s1 = inlined_call_operand.vmem [shape: bf16[256,64], index: 1, kind: input, shape index: {}]   ;;  %s1759_s4 = inlined_call_operand.vmem [shape: f32[128,1], index: 4, kind: input, shape index: {}]   ;;  %s1760_s6 = inlined_call_operand.vmem [shape: f32[32,1], index: 6, kind: input, shape index: {}]   ;;  %s1761_s3 = inlined_call_operand.vmem [shape: bf16[128,256], index: 3, kind: input, shape index: {}]   ;;  %s1762_s5 = inlined_call_operand.vmem [shape: bf16[32,128], index: 5, kind: input, shape index: {}]   ;;  %s1763_s7 = inlined_call_operand.vmem [shape: f32[32,2], index: 7, kind: output, shape index: {}]  }
   0x1   :  { %v33_v0 = vld [vmem:[%s1756_s0 + $0x30] sm:$0xff]  ;;  %v34_v1 = vld [vmem:[%s1756_s0 + $0x38] sm:$0xff]  ;;  %v31_v2 = vld [vmem:[%s1756_s0 + $0x20] sm:$0xff]  ;;  %1222 = vset.pattern.permute.xlu1 %v1265_v3  ;;  %1221 = vset.pattern.permute.xlu0 %v1265_v3 }
   0x2   :  { %v102_v4 = vpack.c.bf16 %v34_v1, %v33_v0  ;;  %v32_v5 = vld [vmem:[%s1756_s0 + $0x28] sm:$0xff]  ;;  %v29_v7 = vld [vmem:[%s1756_s0 + $0x10] sm:$0xff]  ;;  %v30_v8 = vld [vmem:[%s1756_s0 + $0x18] sm:$0xff] }
   0x3   :  { %v101_v6 = vpack.c.bf16 %v32_v5, %v31_v2  ;;  %v97_v9 = vld [vmem:[%s1757_s2 + $0xf0] sm:$0xff]  ;;  %v1223_v11 = vld [vmem:[%s1758_s1] sm:$0xff]   ;;  %v100_v12 = vpack.c.bf16 %v30_v8, %v29_v7  ;;  %v98_v13 = vld [vmem:[%s1757_s2 + $0xf8] sm:$0xff] }
   0x4   :  { %1160 = vmatprep.subr.bf16.mxu0 %v102_v4  ;;  %255 = vperm.xlu0 %1221, %v97_v9   ;;  %v81_v10 = vld [vmem:[%s1757_s2 + $0x70] sm:$0xff]  ;;  %v82_v14 = vld [vmem:[%s1757_s2 + $0x78] sm:$0xff]  ;;  %v27_v15 = vld [vmem:[%s1756_s0] sm:$0xff] }
   0x5   :  { %1161 = vmatpush3.bf16.msra.mxu0 %v102_v4  ;;  %175 = vperm.xlu1 %1222, %v81_v10   ;;  %v28_v16 = vld [vmem:[%s1756_s0 + $0x8] sm:$0xff]  ;;  %v95_v17 = vld [vmem:[%s1757_s2 + $0xe0] sm:$0xff]  ;;  %v1225_v23 = vld [vmem:[%s1758_s1 + $0x10] sm:$0xff]  }
   0x6   :  { %1162 = vmatprep.subr.bf16.mxu0 %v101_v6  ;;  %1168 = vmatprep.mubr.msk.bf16.mxu0 %vm343_vm0, %v1223_v11  ;;  %v99_v18 = vpack.c.bf16 %v28_v16, %v27_v15  ;;  %v96_v19 = vld [vmem:[%s1757_s2 + $0xe8] sm:$0xff]  ;;  %v79_v20 = vld [vmem:[%s1757_s2 + $0x60] sm:$0xff]  ;;  %v93_v24 = vld [vmem:[%s1757_s2 + $0xd0] sm:$0xff] }
   0x7   :  { %v80_v21 = vld [vmem:[%s1757_s2 + $0x68] sm:$0xff]  ;;  %v94_v25 = vld [vmem:[%s1757_s2 + $0xd8] sm:$0xff]  ;;  %v77_v26 = vld [vmem:[%s1757_s2 + $0x50] sm:$0xff] }
   0x8   :  { %260 = vperm.xlu0 %1221, %v98_v13   ;;  %v1224_v22 = vld [vmem:[%s1758_s1 + $0x8] sm:$0xff]   ;;  %v78_v27 = vld [vmem:[%s1757_s2 + $0x58] sm:$0xff]  ;;  %v1227_v29 = vld [vmem:[%s1758_s1 + $0x20] sm:$0xff]  }
   0x9   :  { %1163 = vmatpush3.bf16.msra.mxu0 %v101_v6  ;;  %180 = vperm.xlu1 %1222, %v82_v14   ;;  %v1226_v28 = vld [vmem:[%s1758_s1 + $0x18] sm:$0xff]   ;;  %v91_v30 = vld [vmem:[%s1757_s2 + $0xc0] sm:$0xff]  ;;  %v92_v31 = vld [vmem:[%s1757_s2 + $0xc8] sm:$0xff] }
   0xa   :  { %1164 = vmatprep.subr.bf16.mxu0 %v100_v12  ;;  %v75_v32 = vld [vmem:[%s1757_s2 + $0x40] sm:$0xff]  ;;  %v76_v33 = vld [vmem:[%s1757_s2 + $0x48] sm:$0xff]  ;;  %v1229_v35 = vld [vmem:[%s1758_s1 + $0x30] sm:$0xff]  }
   0xb   :  { %v1228_v34 = vld [vmem:[%s1758_s1 + $0x28] sm:$0xff]   ;;  %v89_v36 = vld [vmem:[%s1757_s2 + $0xb0] sm:$0xff]  ;;  %v90_v37 = vld [vmem:[%s1757_s2 + $0xb8] sm:$0xff] }
   0xc   :  { %245 = vperm.xlu0 %1221, %v95_v17   ;;  %v73_v38 = vld [vmem:[%s1757_s2 + $0x30] sm:$0xff]  ;;  %v74_v39 = vld [vmem:[%s1757_s2 + $0x38] sm:$0xff]  ;;  %v1231_v41 = vld [vmem:[%s1758_s1 + $0x40] sm:$0xff]  }
   0xd   :  { %1165 = vmatpush3.bf16.msra.mxu0 %v100_v12  ;;  %250 = vperm.xlu1 %1222, %v96_v19   ;;  %v1230_v40 = vld [vmem:[%s1758_s1 + $0x38] sm:$0xff]   ;;  %v87_v42 = vld [vmem:[%s1757_s2 + $0xa0] sm:$0xff]  ;;  %v88_v43 = vld [vmem:[%s1757_s2 + $0xa8] sm:$0xff] }
   0xe   :  { %1166 = vmatprep.subr.bf16.mxu0 %v99_v18  ;;  %v71_v44 = vld [vmem:[%s1757_s2 + $0x20] sm:$0xff]  ;;  %v72_v45 = vld [vmem:[%s1757_s2 + $0x28] sm:$0xff]  ;;  %v1233_v47 = vld [vmem:[%s1758_s1 + $0x50] sm:$0xff]  }
   0xf   :  { %v1232_v46 = vld [vmem:[%s1758_s1 + $0x48] sm:$0xff]   ;;  %v85_v48 = vld [vmem:[%s1757_s2 + $0x90] sm:$0xff]  ;;  %v86_v49 = vld [vmem:[%s1757_s2 + $0x98] sm:$0xff] }
  0x10   :  { %165 = vperm.xlu0 %1221, %v79_v20   ;;  %v69_v50 = vld [vmem:[%s1757_s2 + $0x10] sm:$0xff]  ;;  %v70_v51 = vld [vmem:[%s1757_s2 + $0x18] sm:$0xff]  ;;  %v1235_v53 = vld [vmem:[%s1758_s1 + $0x60] sm:$0xff]  }
  0x11   :  { %1167 = vmatpush3.bf16.msra.mxu0 %v99_v18  ;;  %170 = vperm.xlu1 %1222, %v80_v21   ;;  %v1234_v52 = vld [vmem:[%s1758_s1 + $0x58] sm:$0xff]   ;;  %v83_v54 = vld [vmem:[%s1757_s2 + $0x80] sm:$0xff]  ;;  %v84_v55 = vld [vmem:[%s1757_s2 + $0x88] sm:$0xff] }
  0x12   :  { %v67_v56 = vld [vmem:[%s1757_s2] sm:$0xff]  ;;  %v68_v57 = vld [vmem:[%s1757_s2 + $0x8] sm:$0xff]  ;;  %v1237_v59 = vld [vmem:[%s1758_s1 + $0x70] sm:$0xff]  }
  0x13   :  { %v1236_v58 = vld [vmem:[%s1758_s1 + $0x68] sm:$0xff]   ;;  %v615_v60 = vld [vmem:[%s1759_s4 + $0x70] sm:$0xff]  ;;  %v616_v61 = vld [vmem:[%s1759_s4 + $0x78] sm:$0xff] }
  0x14   :  { %1169 = vmatmul.mubr.msk.bf16.vlgmr.msra.gmra.mxu0 %vm343_vm0, %v1224_v22  ;;  %235 = vperm.xlu0 %1221, %v93_v24   ;;  %v613_v62 = vld [vmem:[%s1759_s4 + $0x60] sm:$0xff]  ;;  %v614_v63 = vld [vmem:[%s1759_s4 + $0x68] sm:$0xff]  ;;  %v1238_v0 = vld [vmem:[%s1758_s1 + $0x78] sm:$0xff]  }
  0x15   :  { %1172 = vmatprep.mubr.msk.bf16.mxu0 %vm343_vm0, %v1225_v23  ;;  %240 = vperm.xlu1 %1222, %v94_v25   ;;  %v611_v1 = vld [vmem:[%s1759_s4 + $0x50] sm:$0xff]  ;;  %v612_v2 = vld [vmem:[%s1759_s4 + $0x58] sm:$0xff]  ;;  %v609_v3 = vld [vmem:[%s1759_s4 + $0x40] sm:$0xff] }
  0x16   :  { %v610_v4 = vld [vmem:[%s1759_s4 + $0x48] sm:$0xff]  ;;  %v607_v5 = vld [vmem:[%s1759_s4 + $0x30] sm:$0xff]  ;;  %v608_v6 = vld [vmem:[%s1759_s4 + $0x38] sm:$0xff] }
  0x17   :  { %v605_v7 = vld [vmem:[%s1759_s4 + $0x20] sm:$0xff]  ;;  %v606_v8 = vld [vmem:[%s1759_s4 + $0x28] sm:$0xff]  ;;  %v603_v9 = vld [vmem:[%s1759_s4 + $0x10] sm:$0xff] }
  0x18   :  { %155 = vperm.xlu0 %1221, %v77_v26   ;;  %v604_v10 = vld [vmem:[%s1759_s4 + $0x18] sm:$0xff]  ;;  %v601_v11 = vld [vmem:[%s1759_s4] sm:$0xff]  ;;  %v602_v12 = vld [vmem:[%s1759_s4 + $0x8] sm:$0xff] }
  0x19   :  { %160 = vperm.xlu1 %1222, %v78_v27   ;;  %v910_v13 = vld [vmem:[%s1760_s6] sm:$0xff]  ;;  %v911_v14 = vld [vmem:[%s1760_s6 + $0x8] sm:$0xff]  ;;  %v912_v15 = vld [vmem:[%s1760_s6 + $0x10] sm:$0xff] }
  0x1a   :  { %v913_v16 = vld [vmem:[%s1760_s6 + $0x18] sm:$0xff] }
  0x1c   :  { %1173 = vmatmul.mubr.msk.bf16.gmra.mxu0 %vm343_vm0, %v1226_v28  ;;  %225 = vperm.xlu0 %1221, %v91_v30  }
  0x1d   :  { %1176 = vmatprep.mubr.msk.bf16.mxu0 %vm343_vm0, %v1227_v29  ;;  %230 = vperm.xlu1 %1222, %v92_v31  }
  0x20   :  { %145 = vperm.xlu0 %1221, %v75_v32  }
  0x21   :  { %150 = vperm.xlu1 %1222, %v76_v33  }
  0x24   :  { %1177 = vmatmul.mubr.msk.bf16.gmra.mxu0 %vm343_vm0, %v1228_v34  ;;  %215 = vperm.xlu0 %1221, %v89_v36   ;;  %v1241_v36 = vld [vmem:[%s1761_s3 + $0x4] ss:$8 sps:$4 sm:$0xff]  }
  0x25   :  { %1180 = vmatprep.mubr.msk.bf16.mxu0 %vm343_vm0, %v1229_v35  ;;  %220 = vperm.xlu1 %1222, %v90_v37  }
  0x26   :  { %825 = vmatprep.mubr.bf16.mxu1 %v1241_v36 }
  0x28   :  { %135 = vperm.xlu0 %1221, %v73_v38  }
  0x29   :  { %140 = vperm.xlu1 %1222, %v74_v39  }
  0x2c   :  { %1181 = vmatmul.mubr.msk.bf16.gmra.mxu0 %vm343_vm0, %v1230_v40  ;;  %205 = vperm.xlu0 %1221, %v87_v42  }
  0x2d   :  { %1184 = vmatprep.mubr.msk.bf16.mxu0 %vm343_vm0, %v1231_v41  ;;  %210 = vperm.xlu1 %1222, %v88_v43  }
  0x30   :  { %125 = vperm.xlu0 %1221, %v71_v44  }
  0x31   :  { %130 = vperm.xlu1 %1222, %v72_v45  }
  0x34   :  { %1185 = vmatmul.mubr.msk.bf16.gmra.mxu0 %vm343_vm0, %v1232_v46  ;;  %195 = vperm.xlu0 %1221, %v85_v48  }
  0x35   :  { %1188 = vmatprep.mubr.msk.bf16.mxu0 %vm343_vm0, %v1233_v47  ;;  %200 = vperm.xlu1 %1222, %v86_v49  }
  0x38   :  { %115 = vperm.xlu0 %1221, %v69_v50  }
  0x39   :  { %120 = vperm.xlu1 %1222, %v70_v51  }
  0x3c   :  { %1189 = vmatmul.mubr.msk.bf16.gmra.mxu0 %vm343_vm0, %v1234_v52  ;;  %185 = vperm.xlu0 %1221, %v83_v54  }
  0x3d   :  { %1192 = vmatprep.mubr.msk.bf16.mxu0 %vm343_vm0, %v1235_v53  ;;  %190 = vperm.xlu1 %1222, %v84_v55  }
  0x40   :  { %105 = vperm.xlu0 %1221, %v67_v56  }
  0x41   :  { %110 = vperm.xlu1 %1222, %v68_v57  }
  0x44   :  { %1193 = vmatmul.mubr.msk.bf16.gmra.mxu0 %vm343_vm0, %v1236_v58  ;;  %705 = vperm.xlu0 %1221, %v615_v60  }
  0x45   :  { %1196 = vmatprep.mubr.msk.bf16.mxu0 %vm343_vm0, %v1237_v59  ;;  %710 = vperm.xlu1 %1222, %v616_v61  }
  0x48   :  { %695 = vperm.xlu0 %1221, %v613_v62  }
  0x49   :  { %700 = vperm.xlu1 %1222, %v614_v63  }
  0x4c   :  { %1197 = vmatmul.mubr.msk.bf16.gmra.mxu0 %vm343_vm0, %v1238_v0  ;;  %685 = vperm.xlu0 %1221, %v611_v1  }
  0x4d   :  { %690 = vperm.xlu1 %1222, %v612_v2  }
  0x50   :  { %675 = vperm.xlu0 %1221, %v609_v3  }
  0x51   :  { %680 = vperm.xlu1 %1222, %v610_v4  }
  0x54   :  { %665 = vperm.xlu0 %1221, %v607_v5  }
  0x55   :  { %670 = vperm.xlu1 %1222, %v608_v6  }
  0x58   :  { %655 = vperm.xlu0 %1221, %v605_v7  }
  0x59   :  { %660 = vperm.xlu1 %1222, %v606_v8  }
  0x5c   :  { %645 = vperm.xlu0 %1221, %v603_v9  }
  0x5d   :  { %650 = vperm.xlu1 %1222, %v604_v10  }
  0x60   :  { %635 = vperm.xlu0 %1221, %v601_v11  }
  0x61   :  { %640 = vperm.xlu1 %1222, %v602_v12  }
  0x64   :  { %924 = vperm.xlu0 %1221, %v910_v13  }
  0x65   :  { %929 = vperm.xlu1 %1222, %v911_v14  }
  0x68   :  { %934 = vperm.xlu0 %1221, %v912_v15  }
  0x69   :  { %939 = vperm.xlu1 %1222, %v913_v16  }
  0x7f   :  { %v1550_v17 = vpop.permute.xlu0 %255 }
  0x80   :  { %v1552_v18 = vpop.permute.xlu1 %175 }
  0x83   :  { %v1554_v19 = vpop.permute.xlu0 %260 }
  0x84   :  { %v1556_v20 = vpop.permute.xlu1 %180 }
  0x87   :  { %v1558_v21 = vpop.permute.xlu0 %245 }
  0x88   :  { %v1560_v22 = vpop.permute.xlu1 %250 }
  0x8b   :  { %v1562_v23 = vpop.permute.xlu0 %165 }
  0x8c   :  { %v1564_v24 = vpop.permute.xlu1 %170 }
  0x8f   :  { %v1566_v25 = vpop.permute.xlu0 %235 }
  0x90   :  { %v1568_v26 = vpop.permute.xlu1 %240 }
  0x93   :  { %v1570_v27 = vpop.permute.xlu0 %155 }
  0x94   :  { %v1572_v28 = vpop.permute.xlu1 %160 }
  0x97   :  { %v1574_v29 = vpop.permute.xlu0 %225 }
  0x98   :  { %v1576_v30 = vpop.permute.xlu1 %230 }
  0x9b   :  { %v1578_v31 = vpop.permute.xlu0 %145 }
  0x9c   :  { %v1580_v32 = vpop.permute.xlu1 %150 }
  0x9f   :  { %v1582_v33 = vpop.permute.xlu0 %215 }
  0xa0   :  { %v1584_v34 = vpop.permute.xlu1 %220 }
  0xa3   :  { %v136_v35 = vpop.permute.xlu0 %135 }
  0xa4   :  { %v141_v37 = vpop.permute.xlu1 %140 }
  0xa7   :  { %v1589_v38 = vpop.permute.xlu0 %205 }
  0xa8   :  { %v1591_v39 = vpop.permute.xlu1 %210 }
  0xab   :  { %v126_v40 = vpop.permute.xlu0 %125 }
  0xac   :  { %v131_v41 = vpop.permute.xlu1 %130 }
  0xaf   :  { %v1593_v42 = vpop.permute.xlu0 %195 }
  0xb0   :  { %v1595_v43 = vpop.permute.xlu1 %200 }
  0xb3   :  { %v116_v44 = vpop.permute.xlu0 %115 }
  0xb4   :  { %v121_v45 = vpop.permute.xlu1 %120 }
  0xb7   :  { %v1597_v46 = vpop.permute.xlu0 %185 }
  0xb8   :  { %v1599_v47 = vpop.permute.xlu1 %190 }
  0xbb   :  { %v106_v51 = vpop.permute.xlu0 %105 }
  0xbc   :  { %v111_v55 = vpop.permute.xlu1 %110 }
  0xd4   :  { %v1170_v48 = vpop.f32.mrf.mxu0 }
  0xd5   :  { %v435_v50 = vadd.f32 %v1170_v48, %v116_v44 }
  0xd6   :  { %v426_v49 = vpop.f32.mrf.mxu0 }
  0xd7   :  { %v427_v53 = vadd.f32 %v426_v49, %v106_v51  ;;  %v555_v57 = vmax.f32 %v435_v50, 0.0 }
  0xd8   :  { %v1171_v52 = vpop.f32.mrf.mxu0 }
  0xd9   :  { %v438_v54 = vadd.f32 %v1171_v52, %v121_v45  ;;  %v553_v61 = vmax.f32 %v427_v53, 0.0 }
  0xda   :  { %v429_v56 = vpop.f32.mrf.mxu0 }
  0xdb   :  { %v556_v58 = vmax.f32 %v438_v54, 0.0  ;;  %v430_v59 = vadd.f32 %v429_v56, %v111_v55 }
  0xdc   :  { %v1174_v60 = vpop.f32.mrf.mxu0 }
  0xdd   :  { %v1601_v62 = vpack.c.bf16 %v556_v58, %v555_v57  ;;  %v554_v63 = vmax.f32 %v430_v59, 0.0  ;;  %v451_v2 = vadd.f32 %v1174_v60, %v136_v35 }
  0xde   :  { %v442_v0 = vpop.f32.mrf.mxu0 }
  0xdf   :  { %v1603_v1 = vpack.c.bf16 %v554_v63, %v553_v61  ;;  %v443_v4 = vadd.f32 %v442_v0, %v126_v40  ;;  %v559_v7 = vmax.f32 %v451_v2, 0.0 }
  0xe0   :  { %v1175_v3 = vpop.f32.mrf.mxu0 }
  0xe1   :  { %v454_v5 = vadd.f32 %v1175_v3, %v141_v37  ;;  %v557_v11 = vmax.f32 %v443_v4, 0.0 }
  0xe2   :  { %v445_v6 = vpop.f32.mrf.mxu0 }
  0xe3   :  { %v560_v8 = vmax.f32 %v454_v5, 0.0  ;;  %v446_v9 = vadd.f32 %v445_v6, %v131_v41 }
  0xe4   :  { %v1178_v10 = vpop.f32.mrf.mxu0 }
  0xe5   :  { %v1605_v12 = vpack.c.bf16 %v560_v8, %v559_v7  ;;  %v558_v13 = vmax.f32 %v446_v9, 0.0 }
  0xe6   :  { %v458_v14 = vpop.f32.mrf.mxu0 }
  0xe7   :  { %v1607_v15 = vpack.c.bf16 %v558_v13, %v557_v11 }
  0xe8   :  { %v1179_v16 = vpop.f32.mrf.mxu0 }
  0xea   :  { %v461_v36 = vpop.f32.mrf.mxu0 }
  0xec   :  { %v1182_v44 = vpop.f32.mrf.mxu0 }
  0xed   :  { %v483_v63 = vadd.f32 %v1182_v44, %v1552_v18 }
  0xee   :  { %v474_v45 = vpop.f32.mrf.mxu0 }
  0xef   :  { %v567_v11 = vmax.f32 %v483_v63, 0.0 }
  0xf0   :  { %v1183_v35 = vpop.f32.mrf.mxu0 }
  0xf1   :  { %v486_v59 = vadd.f32 %v1183_v35, %v1556_v20 }
  0xf2   :  { %v477_v48 = vpop.f32.mrf.mxu0 }
  0xf3   :  { %v568_v4 = vmax.f32 %v486_v59, 0.0  ;;  %v478_v5 = vadd.f32 %v477_v48, %v1564_v24 }
  0xf4   :  { %v1609_v40 = vpop.f32.mrf.mxu0 }
  0xf5   :  { %v566_v35 = vmax.f32 %v478_v5, 0.0  ;;  %v1254_v5 = vld [vmem:[%s1761_s3 + $0x54] ss:$8 sps:$4 sm:$0xff]  }
  0xf6   :  { %v1611_v37 = vpop.f32.mrf.mxu0 }
  0xf8   :  { %v1613_v49 = vpop.f32.mrf.mxu0 }
  0xfa   :  { %v1615_v41 = vpop.f32.mrf.mxu0 }
  0xfc   :  { %v1190_v50 = vpop.f32.mrf.mxu0 }
  0xfe   :  { %v506_v51 = vpop.f32.mrf.mxu0 }
 0x100   :  { %v1191_v52 = vpop.f32.mrf.mxu0 }
 0x102   :  { %v509_v53 = vpop.f32.mrf.mxu0 }
 0x104   :  { %v1194_v54 = vpop.f32.mrf.mxu0 }
 0x105   :  { %v531_v18 = vadd.f32 %v1194_v54, %v1566_v25 }
 0x106   :  { %v522_v55 = vpop.f32.mrf.mxu0 }
 0x107   :  { %v579_v59 = vmax.f32 %v531_v18, 0.0 }
 0x108   :  { %v1195_v56 = vpop.f32.mrf.mxu0 }
 0x109   :  { %v534_v7 = vadd.f32 %v1195_v56, %v1568_v26  ;;  %v467_v56 = vadd.f32 %v1178_v10, %v1570_v27  ;;  %v515_v27 = vadd.f32 %v1190_v50, %v1582_v33  ;;  %v499_v50 = vadd.f32 %v1609_v40, %v1593_v42  ;;  %v1250_v40 = vld [vmem:[%s1761_s3 + $0x30] ss:$8 sps:$4 sm:$0xff]  }
 0x10a   :  { %v525_v57 = vpop.f32.mrf.mxu0 }
 0x10b   :  { %v580_v24 = vmax.f32 %v534_v7, 0.0  ;;  %v526_v48 = vadd.f32 %v525_v57, %v1576_v30  ;;  %v459_v30 = vadd.f32 %v458_v14, %v1578_v31  ;;  %v502_v31 = vadd.f32 %v1613_v49, %v1595_v43  ;;  %v1257_v7 = vld [vmem:[%s1761_s3 + $0x64] ss:$8 sps:$4 sm:$0xff]  }
 0x10c   :  { %v1198_v58 = vpop.f32.mrf.mxu0 }
 0x10d   :  { %v547_v61 = vadd.f32 %v1198_v58, %v1550_v17  ;;  %v475_v17 = vadd.f32 %v474_v45, %v1562_v23  ;;  %v624_v58 = vpack.c.bf16 %v568_v4, %v567_v11  ;;  %v523_v23 = vadd.f32 %v522_v55, %v1574_v29  ;;  %v1694_v11 = vpop.permute.xlu0 %705 }
 0x10e   :  { %v538_v60 = vpop.f32.mrf.mxu0  ;;  %v462_v45 = vadd.f32 %v461_v36, %v1580_v32  ;;  %v510_v55 = vadd.f32 %v509_v53, %v1591_v39  ;;  %v561_v32 = vmax.f32 %v459_v30, 0.0  ;;  %v575_v36 = vmax.f32 %v515_v27, 0.0 }
 0x10f   :  { %v539_v2 = vadd.f32 %v538_v60, %v1558_v21  ;;  %v583_v8 = vmax.f32 %v547_v61, 0.0  ;;  %v578_v60 = vmax.f32 %v526_v48, 0.0  ;;  %v563_v61 = vmax.f32 %v467_v56, 0.0 }
 0x110   :  { %v1199_v0 = vpop.f32.mrf.mxu0  ;;  %v577_v10 = vmax.f32 %v523_v23, 0.0  ;;  %v562_v63 = vmax.f32 %v462_v45, 0.0  ;;  %v574_v33 = vmax.f32 %v510_v55, 0.0  ;;  %v572_v39 = vmax.f32 %v502_v31, 0.0 }
 0x111   :  { %v550_v3 = vadd.f32 %v1199_v0, %v1554_v19  ;;  %v581_v13 = vmax.f32 %v539_v2, 0.0  ;;  %v470_v19 = vadd.f32 %v1179_v16, %v1572_v28  ;;  %v518_v28 = vadd.f32 %v1191_v52, %v1584_v34  ;;  %v1698_v18 = vpop.permute.xlu0 %695 }
 0x112   :  { %v541_v6 = vpop.f32.mrf.mxu0  ;;  %v630_v16 = vpack.c.bf16 %v580_v24, %v579_v59  ;;  %v629_v0 = vpack.c.bf16 %v578_v60, %v577_v10  ;;  %v507_v34 = vadd.f32 %v506_v51, %v1589_v38  ;;  %v621_v52 = vpack.c.bf16 %v562_v63, %v561_v32 }
 0x113   :  { %v584_v9 = vmax.f32 %v550_v3, 0.0  ;;  %v542_v20 = vadd.f32 %v541_v6, %v1560_v22  ;;  %v565_v22 = vmax.f32 %v475_v17, 0.0  ;;  %v564_v25 = vmax.f32 %v470_v19, 0.0  ;;  %v1256_v6 = vld [vmem:[%s1761_s3 + $0x50] ss:$8 sps:$4 sm:$0xff]   ;;  %v1696_v17 = vpop.permute.xlu1 %710 }
 0x114   :  { %v576_v29 = vmax.f32 %v518_v28, 0.0  ;;  %v573_v2 = vmax.f32 %v507_v34, 0.0  ;;  %v494_v53 = vadd.f32 %v1615_v41, %v1599_v47  ;;  %v571_v38 = vmax.f32 %v499_v50, 0.0  ;;  %v1239_v47 = vld [vmem:[%s1761_s3] ss:$8 sps:$4 sm:$0xff]  }
 0x115   :  { %v582_v44 = vmax.f32 %v542_v20, 0.0  ;;  %v632_v21 = vpack.c.bf16 %v584_v9, %v583_v8  ;;  %v623_v54 = vpack.c.bf16 %v566_v35, %v565_v22  ;;  %v622_v57 = vpack.c.bf16 %v564_v25, %v563_v61  ;;  %v1253_v41 = vld [vmem:[%s1761_s3 + $0x40] ss:$8 sps:$4 sm:$0xff]   ;;  %v1260_v9 = vld [vmem:[%s1761_s3 + $0x74] ss:$8 sps:$4 sm:$0xff]  }
 0x116   :  { %v628_v14 = vpack.c.bf16 %v576_v29, %v575_v36  ;;  %v627_v3 = vpack.c.bf16 %v574_v33, %v573_v2  ;;  %v491_v51 = vadd.f32 %v1611_v37, %v1597_v46  ;;  %v626_v43 = vpack.c.bf16 %v572_v39, %v571_v38  ;;  %v1242_v46 = vld [vmem:[%s1761_s3 + $0x14] ss:$8 sps:$4 sm:$0xff]   ;;  %v1251_v37 = vld [vmem:[%s1761_s3 + $0x44] ss:$8 sps:$4 sm:$0xff]   ;;  %v1259_v8 = vld [vmem:[%s1761_s3 + $0x60] ss:$8 sps:$4 sm:$0xff]  }
 0x117   :  { %v631_v26 = vpack.c.bf16 %v582_v44, %v581_v13  ;;  %1086 = vmatprep.subr.bf16.mxu1 %v632_v21  ;;  %v570_v49 = vmax.f32 %v494_v53, 0.0  ;;  %v1262_v20 = vld [vmem:[%s1761_s3 + $0x70] ss:$8 sps:$4 sm:$0xff]   ;;  %v1700_v13 = vpop.permute.xlu1 %700  ;;  %v1263_v44 = vld [vmem:[%s1762_s5] sm:$0xff]   ;;  %v1705_v21 = vpop.permute.xlu0 %685 }
 0x118   :  { %1087 = vmatpush3.bf16.msra.mxu1 %v624_v58  ;;  %v569_v4 = vmax.f32 %v491_v51, 0.0  ;;  %1216 = vmatprep.mubr.bf16.mxu0 %v1263_v44 }
 0x119   :  { %1088 = vmatprep.subr.bf16.mxu1 %v631_v26 }
 0x11a   :  { %v625_v42 = vpack.c.bf16 %v570_v49, %v569_v4 }
 0x11b   :  { %v1707_v19 = vpop.permute.xlu1 %690  ;;  %v1709_v35 = vpop.permute.xlu0 %675 }
 0x11c   :  { %1089 = vmatpush3.bf16.msra.mxu1 %v623_v54 }
 0x11d   :  { %1090 = vmatprep.subr.bf16.mxu1 %v630_v16 }
 0x11f   :  { %v1711_v58 = vpop.permute.xlu1 %680  ;;  %v1713_v24 = vpop.permute.xlu0 %665 }
 0x120   :  { %1091 = vmatpush3.bf16.msra.mxu1 %v622_v57 }
 0x121   :  { %1092 = vmatprep.subr.bf16.mxu1 %v629_v0 }
 0x123   :  { %v1715_v48 = vpop.permute.xlu1 %670  ;;  %v1717_v26 = vpop.permute.xlu0 %655 }
 0x124   :  { %1093 = vmatpush3.bf16.msra.mxu1 %v621_v52 }
 0x125   :  { %1094 = vmatprep.subr.bf16.mxu1 %v628_v14 }
 0x127   :  { %v1719_v56 = vpop.permute.xlu1 %660  ;;  %v646_v22 = vpop.permute.xlu0 %645 }
 0x128   :  { %1095 = vmatpush3.bf16.msra.mxu1 %v1605_v12  ;;  %v1244_v12 = vld [vmem:[%s1761_s3 + $0x10] ss:$8 sps:$4 sm:$0xff]  }
 0x129   :  { %1096 = vmatprep.subr.bf16.mxu1 %v627_v3 }
 0x12b   :  { %v651_v23 = vpop.permute.xlu1 %650  ;;  %v636_v28 = vpop.permute.xlu0 %635 }
 0x12c   :  { %1097 = vmatpush3.bf16.msra.mxu1 %v1607_v15  ;;  %v1248_v15 = vld [vmem:[%s1761_s3 + $0x34] ss:$8 sps:$4 sm:$0xff]  }
 0x12d   :  { %1098 = vmatprep.subr.bf16.mxu1 %v626_v43 }
 0x12f   :  { %v641_v30 = vpop.permute.xlu1 %640 }
 0x130   :  { %1099 = vmatpush3.bf16.msra.mxu1 %v1601_v62  ;;  %v1245_v62 = vld [vmem:[%s1761_s3 + $0x24] ss:$8 sps:$4 sm:$0xff]  }
 0x131   :  { %1100 = vmatprep.subr.bf16.mxu1 %v625_v42 }
 0x134   :  { %1101 = vmatpush3.bf16.msra.mxu1 %v1603_v1  ;;  %v1247_v1 = vld [vmem:[%s1761_s3 + $0x20] ss:$8 sps:$4 sm:$0xff]  }
 0x137   :  { %826 = vmatmul.mubr.bf16.vlgmr.msra.gmra.mxu1 %v1239_v47 }
 0x138   :  { %833 = vmatprep.mubr.bf16.mxu1 %v1242_v46 }
 0x13f   :  { %834 = vmatmul.mubr.bf16.gmra.mxu1 %v1244_v12 }
 0x140   :  { %841 = vmatprep.mubr.bf16.mxu1 %v1245_v62 }
 0x147   :  { %842 = vmatmul.mubr.bf16.gmra.mxu1 %v1247_v1 }
 0x148   :  { %849 = vmatprep.mubr.bf16.mxu1 %v1248_v15 }
 0x14f   :  { %850 = vmatmul.mubr.bf16.gmra.mxu1 %v1250_v40 }
 0x150   :  { %857 = vmatprep.mubr.bf16.mxu1 %v1251_v37 }
 0x157   :  { %858 = vmatmul.mubr.bf16.gmra.mxu1 %v1253_v41 }
 0x158   :  { %865 = vmatprep.mubr.bf16.mxu1 %v1254_v5 }
 0x15f   :  { %866 = vmatmul.mubr.bf16.gmra.mxu1 %v1256_v6 }
 0x160   :  { %873 = vmatprep.mubr.bf16.mxu1 %v1257_v7 }
 0x167   :  { %874 = vmatmul.mubr.bf16.gmra.mxu1 %v1259_v8 }
 0x168   :  { %881 = vmatprep.mubr.bf16.mxu1 %v1260_v9 }
 0x16f   :  { %882 = vmatmul.mubr.bf16.gmra.mxu1 %v1262_v20 }
 0x1f7   :  { %v1102_v59 = vpop.f32.mrf.mxu1 }
 0x1f9   :  { %v1103_v25 = vpop.f32.mrf.mxu1 }
 0x1fa   :  { %v1104_v45 = vadd.f32 %v1103_v25, %v1102_v59 }
 0x1fb   :  { %v1105_v54 = vpop.f32.mrf.mxu1 }
 0x1fc   :  { %v828_v60 = vadd.f32 %v1104_v45, %v636_v28 }
 0x1fd   :  { %v1106_v16 = vpop.f32.mrf.mxu1 }
 0x1fe   :  { %v1107_v61 = vadd.f32 %v1106_v16, %v1105_v54  ;;  %v890_v63 = vmax.f32 %v828_v60, 0.0 }
 0x1ff   :  { %v1108_v27 = vpop.f32.mrf.mxu1 }
 0x200   :  { %v831_v10 = vadd.f32 %v1107_v61, %v641_v30 }
 0x201   :  { %v1109_v57 = vpop.f32.mrf.mxu1 }
 0x202   :  { %v891_v29 = vmax.f32 %v831_v10, 0.0  ;;  %v1110_v55 = vadd.f32 %v1109_v57, %v1108_v27 }
 0x203   :  { %v1111_v0 = vpop.f32.mrf.mxu1 }
 0x204   :  { %v1721_v32 = vpack.c.bf16 %v891_v29, %v890_v63  ;;  %v836_v34 = vadd.f32 %v1110_v55, %v646_v22 }
 0x205   :  { %v1112_v36 = vpop.f32.mrf.mxu1 }
 0x206   :  { %v1113_v52 = vadd.f32 %v1112_v36, %v1111_v0  ;;  %v892_v50 = vmax.f32 %v836_v34, 0.0 }
 0x207   :  { %v1114_v31 = vpop.f32.mrf.mxu1 }
 0x208   :  { %v839_v14 = vadd.f32 %v1113_v52, %v651_v23 }
 0x209   :  { %v1115_v33 = vpop.f32.mrf.mxu1 }
 0x20a   :  { %v893_v2 = vmax.f32 %v839_v14, 0.0 }
 0x20b   :  { %v1117_v39 = vpop.f32.mrf.mxu1 }
 0x20c   :  { %v1723_v53 = vpack.c.bf16 %v893_v2, %v892_v50 }
 0x20d   :  { %v1118_v3 = vpop.f32.mrf.mxu1 }
 0x20f   :  { %v1120_v38 = vpop.f32.mrf.mxu1 }
 0x211   :  { %v1121_v51 = vpop.f32.mrf.mxu1 }
 0x213   :  { %v1123_v43 = vpop.f32.mrf.mxu1 }
 0x215   :  { %v1124_v49 = vpop.f32.mrf.mxu1 }
 0x217   :  { %v1126_v4 = vpop.f32.mrf.mxu1 }
 0x219   :  { %v1127_v42 = vpop.f32.mrf.mxu1 }
 0x21a   :  { %v1128_v57 = vadd.f32 %v1127_v42, %v1126_v4 }
 0x21b   :  { %v1129_v47 = vpop.f32.mrf.mxu1 }
 0x21d   :  { %v1130_v46 = vpop.f32.mrf.mxu1 }
 0x21e   :  { %v1131_v60 = vadd.f32 %v1130_v46, %v1129_v47 }
 0x21f   :  { %v1132_v12 = vpop.f32.mrf.mxu1 }
 0x221   :  { %v1133_v62 = vpop.f32.mrf.mxu1 }
 0x222   :  { %v1134_v54 = vadd.f32 %v1133_v62, %v1132_v12 }
 0x223   :  { %v1135_v1 = vpop.f32.mrf.mxu1 }
 0x224   :  { %v868_v63 = vadd.f32 %v1134_v54, %v1705_v21  ;;  %v1116_v21 = vadd.f32 %v1115_v33, %v1114_v31 }
 0x225   :  { %v1136_v15 = vpop.f32.mrf.mxu1 }
 0x226   :  { %v1137_v59 = vadd.f32 %v1136_v15, %v1135_v1  ;;  %v900_v34 = vmax.f32 %v868_v63, 0.0 }
 0x227   :  { %v1138_v40 = vpop.f32.mrf.mxu1 }
 0x228   :  { %v871_v61 = vadd.f32 %v1137_v59, %v1707_v19  ;;  %v1119_v19 = vadd.f32 %v1118_v3, %v1117_v39 }
 0x229   :  { %v1139_v37 = vpop.f32.mrf.mxu1 }
 0x22a   :  { %v1140_v44 = vadd.f32 %v1139_v37, %v1138_v40  ;;  %v901_v0 = vmax.f32 %v871_v61, 0.0 }
 0x22b   :  { %v1141_v41 = vpop.f32.mrf.mxu1 }
 0x22c   :  { %v876_v28 = vadd.f32 %v1140_v44, %v1698_v18  ;;  %v1122_v18 = vadd.f32 %v1121_v51, %v1120_v38  ;;  %v919_v50 = vpack.c.bf16 %v901_v0, %v900_v34 }
 0x22d   :  { %v1142_v5 = vpop.f32.mrf.mxu1 }
 0x22e   :  { %v1143_v8 = vadd.f32 %v1142_v5, %v1141_v41  ;;  %v902_v29 = vmax.f32 %v876_v28, 0.0  ;;  %v852_v2 = vadd.f32 %v1122_v18, %v1713_v24  ;;  %v1264_v24 = vld [vmem:[%s1762_s5 + $0x8] sm:$0xff]  }
 0x22f   :  { %v1144_v6 = vpop.f32.mrf.mxu1 }
 0x230   :  { %v879_v23 = vadd.f32 %v1143_v8, %v1700_v13  ;;  %v1125_v13 = vadd.f32 %v1124_v49, %v1123_v43  ;;  %v896_v38 = vmax.f32 %v852_v2, 0.0 }
 0x231   :  { %v1145_v7 = vpop.f32.mrf.mxu1 }
 0x232   :  { %v1146_v9 = vadd.f32 %v1145_v7, %v1144_v6  ;;  %v903_v30 = vmax.f32 %v879_v23, 0.0  ;;  %v855_v52 = vadd.f32 %v1125_v13, %v1715_v48 }
 0x233   :  { %v1147_v20 = vpop.f32.mrf.mxu1 }
 0x234   :  { %v884_v25 = vadd.f32 %v1146_v9, %v1694_v11  ;;  %v863_v11 = vadd.f32 %v1131_v60, %v1711_v58  ;;  %v920_v36 = vpack.c.bf16 %v903_v30, %v902_v29  ;;  %v847_v58 = vadd.f32 %v1119_v19, %v1719_v56  ;;  %v930_v56 = vpop.permute.xlu1 %929 }
 0x235   :  { %v1148_v22 = vpop.f32.mrf.mxu1  ;;  %v897_v49 = vmax.f32 %v855_v52, 0.0 }
 0x236   :  { %v1149_v45 = vadd.f32 %v1148_v22, %v1147_v20  ;;  %v904_v27 = vmax.f32 %v884_v25, 0.0  ;;  %v899_v14 = vmax.f32 %v863_v11, 0.0  ;;  %v895_v39 = vmax.f32 %v847_v58, 0.0 }
 0x237   :  { %v917_v3 = vpack.c.bf16 %v897_v49, %v896_v38 }
 0x238   :  { %v887_v16 = vadd.f32 %v1149_v45, %v1696_v17  ;;  %v860_v17 = vadd.f32 %v1128_v57, %v1709_v35  ;;  %v844_v35 = vadd.f32 %v1116_v21, %v1717_v26  ;;  %v925_v26 = vpop.permute.xlu0 %924  ;;  %v940_v62 = vpop.permute.xlu1 %939 }
 0x23a   :  { %v905_v10 = vmax.f32 %v887_v16, 0.0  ;;  %v898_v43 = vmax.f32 %v860_v17, 0.0  ;;  %v894_v48 = vmax.f32 %v844_v35, 0.0 }
 0x23c   :  { %v921_v55 = vpack.c.bf16 %v905_v10, %v904_v27  ;;  %v918_v4 = vpack.c.bf16 %v899_v14, %v898_v43  ;;  %v916_v51 = vpack.c.bf16 %v895_v39, %v894_v48  ;;  %v935_v31 = vpop.permute.xlu0 %934 }
 0x23e   :  { %1200 = vmatprep.subr.bf16.mxu0 %v921_v55 }
 0x23f   :  { %1201 = vmatpush3.bf16.msra.mxu0 %v921_v55 }
 0x240   :  { %1202 = vmatprep.subr.bf16.mxu0 %v920_v36 }
 0x243   :  { %1203 = vmatpush3.bf16.msra.mxu0 %v920_v36 }
 0x244   :  { %1204 = vmatprep.subr.bf16.mxu0 %v919_v50 }
 0x247   :  { %1205 = vmatpush3.bf16.msra.mxu0 %v919_v50 }
 0x248   :  { %1206 = vmatprep.subr.bf16.mxu0 %v918_v4 }
 0x24b   :  { %1207 = vmatpush3.bf16.msra.mxu0 %v918_v4 }
 0x24c   :  { %1208 = vmatprep.subr.bf16.mxu0 %v917_v3 }
 0x24f   :  { %1209 = vmatpush3.bf16.msra.mxu0 %v917_v3 }
 0x250   :  { %1210 = vmatprep.subr.bf16.mxu0 %v916_v51 }
 0x253   :  { %1211 = vmatpush3.bf16.msra.mxu0 %v916_v51 }
 0x254   :  { %1212 = vmatprep.subr.bf16.mxu0 %v1723_v53 }
 0x257   :  { %1213 = vmatpush3.bf16.msra.mxu0 %v1723_v53 }
 0x258   :  { %1214 = vmatprep.subr.bf16.mxu0 %v1721_v32 }
 0x25b   :  { %1215 = vmatpush3.bf16.msra.mxu0 %v1721_v32 }
 0x25e   :  { %1217 = vmatmul.mubr.bf16.vlgmr.msra.gmra.mxu0 %v1264_v24 }
 0x31e   :  { %v1218_v33 = vpop.f32.mrf.mxu0 }
 0x31f   :  { %v997_v42 = vadd.f32 %v1218_v33, %v935_v31 }
 0x320   :  { %v988_v47 = vpop.f32.mrf.mxu0 }
 0x321   :  { %v1005_v46 = vmax.f32 %v997_v42, 0.0  ;;  %v989_v12 = vadd.f32 %v988_v47, %v925_v26 }
 0x322   :  { %v1219_v53 = vpop.f32.mrf.mxu0 }
 0x323   :  { %1010 = vst.msk [vmem:[%s1763_s7 + $0x10] sm:$0xff] %vm1007_vm1, %v1005_v46  ;;  %v1003_v1 = vmax.f32 %v989_v12, 0.0  ;;  %v1000_v15 = vadd.f32 %v1219_v53, %v940_v62 }
 0x324   :  { %v991_v40 = vpop.f32.mrf.mxu0 }
 0x325   :  { %1008 = vst.msk [vmem:[%s1763_s7] sm:$0xff] %vm1007_vm1, %v1003_v1  ;;  %v1006_v32 = vmax.f32 %v1000_v15, 0.0  ;;  %v992_v37 = vadd.f32 %v991_v40, %v930_v56 }
 0x327   :  { %1011 = vst.msk [vmem:[%s1763_s7 + $0x18] sm:$0xff] %vm1007_vm1, %v1006_v32  ;;  %v1004_v41 = vmax.f32 %v992_v37, 0.0 }
 0x329   :  { %1009 = vst.msk [vmem:[%s1763_s7 + $0x8] sm:$0xff] %vm1007_vm1, %v1004_v41 }

</bundles_post_ra>
